<compile_context>
chip_gen: v7x
topology: tpu7x:2x2x1
jax: 0.10.0
libtpu: 0.0.40
codegen_flags: <defaults>
</compile_context>

<pallas_src>
import numpy as np
import jax
import jax.numpy as jnp
from jax.experimental import pallas as pl
from jax.experimental.pallas import tpu as pltpu

# ------------------------- problem sizes (small) -------------------------
N_TOTAL = 12   # total nodes
N_PART = 8     # partition_nodes.sum()
E = 16         # number of edges in partition
C = 8          # local_cnn_dims
F = 6          # edge_feature_dims  (ef has F+1 columns, last one dropped)
T = 4          # num_temp
H = 16         # decf_mlp_hidden
W = 4          # weight_function_dim
G = 8          # gnn_dim
R = 16         # readout_hid_dim

S = 8          # SAMPLES_PER_STEP: samples folded into one grid step (8-row aligned)


def _ceil8(n):
    return ((n + 7) // 8) * 8


# ----------------- packed-constant buffer layout (static) -----------------
# Every block starts at an 8-row-aligned offset of a single (CONST_ROWS, 128) f32
# buffer; in-kernel access is a static slice.  All structural 0/1 matrices
# (BCAST/EREP/ETILE/GREP/GMASK/SUMB/REP) turn relayout chains into MXU matmuls.
_CONST_BLOCKS = (
    # name  , rows           , cols
    ("LR",    2 * S * E,       S * N_TOTAL),   # [rinc_bd ; lincT_bd] (block-diag / sample)
    ("LINC",  S * N_PART,      S * E),         # block-diag linc
    ("KER0",  S * E,           H),             # ef @ k1w + k1b, tiled over samples
    ("BCAST", S * E,           S),             # per-sample -> per-edge one-hot expand
    ("K2W",   T,               H),
    ("K3W",   C,               H),
    ("K4W",   C,               H),
    ("K5W",   H,               W),
    ("K5B",   1,               W),
    ("EREP",  W,               W * C),         # ker -> (W*C) replicate
    ("ETILE", C,               W * C),         # rx  -> (W*C) tile
    ("GCW",   W * C,           G),
    ("GCB",   1,               G),
    ("GREP",  G,               N_PART * G),    # y -> (N_PART*G) tile
    ("GMASK", S * N_PART,      N_PART * G),    # per-node block mask
    ("R0W",   N_PART * G,      R),
    ("SUMB",  S,               S * N_PART),    # per-sample block row-sum / block-diag mask
    ("REP",   N_PART,          S * N_PART),    # wgt -> (S*N_PART) replicate
    ("R1W",   T,               R),
    ("R1B",   1,               R),             # r1b + cap @ r2w (cap folded in)
    ("R3W",   R,               N_PART),
    ("R3B",   1,               N_PART),
)
_CONST_LAYOUT = {}
_row = 0
for _name, _r, _c in _CONST_BLOCKS:
    _CONST_LAYOUT[_name] = (_row, _r, _c)
    _row += _ceil8(_r)
CONST_ROWS = _ceil8(_row)
CONST_LANES = 128


# ------------------------------ Pallas kernel ------------------------------
def _wdsgcn2_kernel(x_ref, t_ref, cst_ref, out_ref):
    f32 = jnp.float32

    def blk(name):
        off, rows, cols = _CONST_LAYOUT[name]
        return cst_ref[off:off + rows, 0:cols]          # static slice -> load

    def mm(a, b):
        return jnp.dot(a, b, preferred_element_type=f32)

    x = x_ref[...]                                      # (S*N_TOTAL, C)
    t = t_ref[...]                                      # (S, T)

    # ---- [rx ; lx] in one stacked contraction (block-diag over samples) ----
    rl = mm(blk("LR"), x)                               # (2*S*E, C)
    rx = rl[0:S * E, :]                                 # rinc   @ x       (per sample)
    lx = rl[S * E:2 * S * E, :]                         # linc^T @ x_part  (per sample)

    # ---- edge-kernel MLP: all MXU, no lane/sublane concats ------------------
    ker = (blk("KER0")                                  # ef @ k1w + k1b (precomputed)
           + mm(blk("BCAST"), mm(t, blk("K2W")))        # k2(t) broadcast to edges
           + mm(lx, blk("K3W"))
           + mm(rx, blk("K4W")))                        # (S*E, H)
    ker = jnp.where(ker > 0, ker, 0.02 * ker)           # k_act (LeakyReLU 0.02)
    ker = mm(ker, blk("K5W")) + blk("K5B")
    ker = jnp.maximum(ker, 0.0)                         # k_act1 -> (S*E, W)

    # ---- edge messages m[e, w*C+c] = ker[e,w] * rx[e,c] (MXU expand + VPU mul)
    m = mm(ker, blk("EREP")) * mm(rx, blk("ETILE"))     # (S*E, W*C)

    # ---- aggregate to partition nodes + gc -----------------------------------
    y = mm(mm(blk("LINC"), m), blk("GCW")) + blk("GCB")
    y = jnp.maximum(y, 0.0)                             # (S*N_PART, G)

    # ---- readout0 without building y_flat: widen + mask + matmul -------------
    y_exp = mm(y, blk("GREP")) * blk("GMASK")           # (S*N_PART, N_PART*G)
    r0 = mm(blk("SUMB"), mm(y_exp, blk("R0W")))         # (S, R)

    # ---- readout1 (+ folded cap readout2) + readout3 --------------------------
    h = r0 + mm(t, blk("R1W")) + blk("R1B")
    h = jnp.where(h > 0, h, 0.01 * h)                   # readout_act1 (LeakyReLU 0.01)
    wgt = jnp.maximum(mm(h, blk("R3W")) + blk("R3B"), 0.0)   # (S, N_PART)

    # ---- res[s] = wgt[s] @ y[s]  via MXU replicate + block-diag mask ---------
    wgt_bd = mm(wgt, blk("REP")) * blk("SUMB")          # (S, S*N_PART)
    out_ref[...] = mm(wgt_bd, y)                        # (S, G)


# --------------------------- host-side packing ---------------------------
def _block_diag(mat, n):
    mat = np.asarray(mat, np.float32)
    r, c = mat.shape
    out = np.zeros((n * r, n * c), np.float32)
    for i in range(n):
        out[i * r:(i + 1) * r, i * c:(i + 1) * c] = mat
    return out


def pack_consts(consts, params):
    """One-time packing of graph constants + weights into one (CONST_ROWS,128) f32 buffer."""
    linc = np.asarray(consts[0], np.float32)       # (N_PART, E)
    rinc = np.asarray(consts[1], np.float32)       # (E, N_TOTAL)
    ef = np.asarray(consts[2], np.float32)         # (E, F)
    cap = np.asarray(consts[3], np.float32)        # (N_PART,)
    part_idx = np.asarray(consts[4])               # (N_PART,)
    (k1w, k1b, k2w, k3w, k4w, k5w, k5b, gcw, gcb,
     r0w, r1w, r1b, r2w, r3w, r3b) = [np.asarray(p, np.float32) for p in params]

    # scatter linc^T into full-node columns: lincT_full @ x == linc^T @ x[part_idx]
    assert len(np.unique(part_idx)) == N_PART, "partition node indices must be unique"
    lincT_full = np.zeros((E, N_TOTAL), np.float32)
    lincT_full[:, part_idx] = linc.T

    eye = lambda n: np.eye(n, dtype=np.float32)
    ones = lambda s: np.ones(s, np.float32)

    blocks = {
        "LR":    np.concatenate([_block_diag(rinc, S), _block_diag(lincT_full, S)], axis=0),
        "LINC":  _block_diag(linc, S),
        "KER0":  np.tile(ef @ k1w + k1b, (S, 1)),
        "BCAST": np.kron(eye(S), ones((E, 1))),
        "K2W":   k2w, "K3W": k3w, "K4W": k4w, "K5W": k5w, "K5B": k5b,
        "EREP":  np.kron(eye(W), ones((1, C))),
        "ETILE": np.tile(eye(C), (1, W)),
        "GCW":   gcw, "GCB": gcb,
        "GREP":  np.tile(eye(G), (1, N_PART)),
        "GMASK": np.tile(np.kron(eye(N_PART), ones((1, G))), (S, 1)),
        "R0W":   r0w,
        "SUMB":  np.kron(eye(S), ones((1, N_PART))),
        "REP":   np.tile(eye(N_PART), (1, S)),
        "R1W":   r1w,
        "R1B":   r1b + cap[None, :] @ r2w,             # cap readout folded into the bias
        "R3W":   r3w, "R3B": r3b,
    }

    packed = np.zeros((CONST_ROWS, CONST_LANES), np.float32)
    for name, rows, cols in _CONST_BLOCKS:
        off = _CONST_LAYOUT[name][0]
        arr = np.asarray(blocks[name], np.float32)
        assert arr.shape == (rows, cols), (name, arr.shape, (rows, cols))
        packed[off:off + rows, 0:cols] = arr
    return jnp.asarray(packed)


@jax.jit
def wdsgcn2_forward(x, t, consts_packed):
    """x: (B, N_TOTAL, C), t: (B, T), consts_packed from pack_consts() -> (B, G)."""
    b = x.shape[0]
    n_steps = (b + S - 1) // S
    b_pad = n_steps * S
    x = x.astype(jnp.float32)
    t = t.astype(jnp.float32)
    if b_pad != b:   # pad batch to a multiple of the per-step sample count
        x = jnp.concatenate([x, jnp.zeros((b_pad - b, N_TOTAL, C), jnp.float32)], axis=0)
        t = jnp.concatenate([t, jnp.zeros((b_pad - b, T), jnp.float32)], axis=0)
    x_flat = x.reshape(b_pad * N_TOTAL, C)              # free bitcast on host

    out = pl.pallas_call(
        _wdsgcn2_kernel,
        out_shape=jax.ShapeDtypeStruct((b_pad, G), jnp.float32),
        grid=(n_steps,),                                # grid over sample chunks
        in_specs=[
            pl.BlockSpec((S * N_TOTAL, C), lambda i: (i, 0)),      # per-step x block
            pl.BlockSpec((S, T), lambda i: (i, 0)),                # per-step t block
            pl.BlockSpec((CONST_ROWS, CONST_LANES), lambda i: (0, 0)),  # resident consts
        ],
        out_specs=pl.BlockSpec((S, G), lambda i: (i, 0)),
        compiler_params=pltpu.CompilerParams(
            dimension_semantics=("parallel",)),         # independent chunks -> both v7x TCs
    )(x_flat, t, consts_packed)
    return out[:b]


# ----------------------------- pure-JAX reference -----------------------------
def wdsgcn2_reference(x, t, consts, params):
    linc, rinc, ef, cap, part_idx = consts
    (k1w, k1b, k2w, k3w, k4w, k5w, k5b, gcw, gcb,
     r0w, r1w, r1b, r2w, r3w, r3b) = params
    b = x.shape[0]
    x_part = x[:, part_idx, :]

    ker = ef @ k1w + k1b                                  # (E, H)
    ker = ker[None] + (t @ k2w)[:, None, :]               # (B, E, H)
    ker = ker + jnp.einsum('en,bnc,ch->beh', linc.T, x_part, k3w)
    ker = ker + jnp.einsum('en,bnc,ch->beh', rinc, x, k4w)
    ker = jnp.where(ker > 0, ker, 0.02 * ker)
    ker = jnp.maximum(ker @ k5w + k5b, 0.0)               # (B, E, W)

    rx = jnp.einsum('en,bnc->bec', rinc, x)               # (B, E, C)
    m = (ker[:, :, :, None] * rx[:, :, None, :]).reshape(b, E, W * C)
    yf = jnp.einsum('pe,bef->bpf', linc, m)               # (B, N_PART, W*C)
    y = jnp.maximum(yf @ gcw + gcb, 0.0)                  # (B, N_PART, G)

    r0 = y.reshape(b, N_PART * G) @ r0w
    r1 = t @ r1w + r1b
    r2 = cap @ r2w
    h = r0 + r1 + r2[None, :]
    h = jnp.where(h > 0, h, 0.01 * h)
    wgt = jnp.maximum(h @ r3w + r3b, 0.0)                 # (B, N_PART)
    res = jnp.einsum('bp,bpg->bg', wgt, y)
    return res


# ------------------------------------ main ------------------------------------
if __name__ == "__main__":
    key = jax.random.PRNGKey(0)
    ks = jax.random.split(key, 24)
    u = lambda k, shape, lim: jax.random.uniform(k, shape, jnp.float32, -lim, lim)

    # graph constants
    # TODO(synk): the real module loads linc/rinc/ef/cap_feature/partition_nodes from
    # disk (joblib / np.load); deterministic synthetic constants are used here.
    linc = jax.random.normal(ks[0], (N_PART, E), jnp.float32) * 0.3
    rinc = jax.random.normal(ks[1], (E, N_TOTAL), jnp.float32) * 0.3
    ef_full = jax.random.normal(ks[2], (E, F + 1), jnp.float32)
    ef = ef_full[:, :-1]                                   # drop last column (as in forward)
    cap = jax.random.normal(ks[3], (N_PART,), jnp.float32)
    part_idx = jnp.arange(N_PART)                          # partition_nodes mask -> indices

    # Linear weights, stored as (in, out) so y = x @ W + b
    k1w = u(ks[4], (F, H), 1 / np.sqrt(F));   k1b = u(ks[5], (1, H), 1 / np.sqrt(F))
    k2w = u(ks[6], (T, H), 1 / np.sqrt(T))
    k3w = u(ks[7], (C, H), 1 / np.sqrt(C))
    k4w = u(ks[8], (C, H), 1 / np.sqrt(C))
    k5w = u(ks[9], (H, W), 1 / np.sqrt(H));   k5b = u(ks[10], (1, W), 1 / np.sqrt(H))
    gcw = u(ks[11], (W * C, G), 1 / np.sqrt(W * C)); gcb = u(ks[12], (1, G), 1 / np.sqrt(W * C))
    r0w = u(ks[13], (N_PART * G, R), 1 / np.sqrt(N_PART * G))
    r1w = u(ks[14], (T, R), 1 / np.sqrt(T));  r1b = u(ks[15], (1, R), 1 / np.sqrt(T))
    r2w = u(ks[16], (N_PART, R), 1 / np.sqrt(N_PART))
    r3w = u(ks[17], (R, N_PART), 1 / np.sqrt(R)); r3b = u(ks[18], (1, N_PART), 1 / np.sqrt(R))

    params = (k1w, k1b, k2w, k3w, k4w, k5w, k5b, gcw, gcb,
              r0w, r1w, r1b, r2w, r3w, r3b)
    consts = (linc, rinc, ef, cap, part_idx)

    consts_packed = jax.block_until_ready(pack_consts(consts, params))

    # case 1: batch = 2 (module's toy batch; padded into a single 8-sample grid step)
    x = jax.random.normal(ks[19], (2, N_TOTAL, C), jnp.float32)
    t = jax.random.normal(ks[20], (2, T), jnp.float32)
    out = jax.block_until_ready(wdsgcn2_forward(x, t, consts_packed))
    ref = wdsgcn2_reference(x, t, consts, params)
    np.testing.assert_allclose(np.asarray(out), np.asarray(ref), rtol=1e-4, atol=1e-4)

    # case 2: batch = 20 (padded to 24 -> grid=(3,), exercising the batched grid path)
    x2 = jax.random.normal(ks[21], (20, N_TOTAL, C), jnp.float32)
    t2 = jax.random.normal(ks[22], (20, T), jnp.float32)
    out2 = jax.block_until_ready(wdsgcn2_forward(x2, t2, consts_packed))
    ref2 = wdsgcn2_reference(x2, t2, consts, params)
    np.testing.assert_allclose(np.asarray(out2), np.asarray(ref2), rtol=1e-4, atol=1e-4)

    print("KERNEL_OK")
</pallas_src>

<mosaic_0001>
module attributes {stable_mosaic.version = 11 : i64} {
  func.func @_wdsgcn2_kernel(%arg0: i32, %arg1: memref<96x8xf32, #tpu.memory_space<vmem>>, %arg2: memref<8x4xf32, #tpu.memory_space<vmem>>, %arg3: memref<872x128xf32, #tpu.memory_space<vmem>>, %arg4: memref<8x8xf32, #tpu.memory_space<vmem>>) attributes {dimension_semantics = [#tpu.dimension_semantics<parallel>], iteration_bounds = array<i64: 1>, scalar_prefetch = 0 : i64, scratch_operands = 0 : i64, tpu.core_type = #tpu.core_type<tc>, window_params = [{transform_indices = @transform_0, window_bounds = array<i64: 96, 8>}, {transform_indices = @transform_1, window_bounds = array<i64: 8, 4>}, {pipeline_mode = #tpu.pipeline_mode<synchronous>, transform_indices = @transform_2, window_bounds = array<i64: 872, 128>}, {transform_indices = @transform_3, window_bounds = array<i64: 8, 8>}]} {
    %c0 = arith.constant 0 : index
    %c0_0 = arith.constant 0 : index
    %0 = vector.load %arg1[%c0, %c0_0] : memref<96x8xf32, #tpu.memory_space<vmem>>, vector<96x8xf32>
    %c0_1 = arith.constant 0 : index
    %c0_2 = arith.constant 0 : index
    %1 = vector.load %arg2[%c0_1, %c0_2] : memref<8x4xf32, #tpu.memory_space<vmem>>, vector<8x4xf32>
    %c0_3 = arith.constant 0 : index
    %c0_4 = arith.constant 0 : index
    %2 = vector.load %arg3[%c0_3, %c0_4] : memref<872x128xf32, #tpu.memory_space<vmem>>, vector<256x96xf32>
    %cst = arith.constant dense<0.000000e+00> : vector<256x8xf32>
    %3 = tpu.matmul %2, %0, %cst {dimension_numbers = #tpu.dot_dimension_numbers<[1], [0], [0], [1], [0, 0, 1, 1], [], []>} : vector<256x96xf32>, vector<96x8xf32>, vector<256x8xf32> -> vector<256x8xf32>
    %4 = vector.extract_strided_slice %3 {offsets = [0, 0], sizes = [128, 8], strides = [1, 1]} : vector<256x8xf32> to vector<128x8xf32>
    %5 = vector.extract_strided_slice %3 {offsets = [128, 0], sizes = [128, 8], strides = [1, 1]} : vector<256x8xf32> to vector<128x8xf32>
    %c320 = arith.constant 320 : index
    %c0_5 = arith.constant 0 : index
    %6 = vector.load %arg3[%c320, %c0_5] : memref<872x128xf32, #tpu.memory_space<vmem>>, vector<128x16xf32>
    %c448 = arith.constant 448 : index
    %c0_6 = arith.constant 0 : index
    %7 = vector.load %arg3[%c448, %c0_6] : memref<872x128xf32, #tpu.memory_space<vmem>>, vector<128x8xf32>
    %c576 = arith.constant 576 : index
    %c0_7 = arith.constant 0 : index
    %8 = vector.load %arg3[%c576, %c0_7] : memref<872x128xf32, #tpu.memory_space<vmem>>, vector<4x16xf32>
    %cst_8 = arith.constant dense<0.000000e+00> : vector<8x16xf32>
    %9 = tpu.matmul %1, %8, %cst_8 {dimension_numbers = #tpu.dot_dimension_numbers<[1], [0], [0], [1], [0, 0, 1, 1], [], []>} : vector<8x4xf32>, vector<4x16xf32>, vector<8x16xf32> -> vector<8x16xf32>
    %cst_9 = arith.constant dense<0.000000e+00> : vector<128x16xf32>
    %10 = tpu.matmul %7, %9, %cst_9 {dimension_numbers = #tpu.dot_dimension_numbers<[1], [0], [0], [1], [0, 0, 1, 1], [], []>} : vector<128x8xf32>, vector<8x16xf32>, vector<128x16xf32> -> vector<128x16xf32>
    %11 = arith.addf %6, %10 : vector<128x16xf32>
    %c584 = arith.constant 584 : index
    %c0_10 = arith.constant 0 : index
    %12 = vector.load %arg3[%c584, %c0_10] : memref<872x128xf32, #tpu.memory_space<vmem>>, vector<8x16xf32>
    %cst_11 = arith.constant dense<0.000000e+00> : vector<128x16xf32>
    %13 = tpu.matmul %5, %12, %cst_11 {dimension_numbers = #tpu.dot_dimension_numbers<[1], [0], [0], [1], [0, 0, 1, 1], [], []>} : vector<128x8xf32>, vector<8x16xf32>, vector<128x16xf32> -> vector<128x16xf32>
    %14 = arith.addf %11, %13 : vector<128x16xf32>
    %c592 = arith.constant 592 : index
    %c0_12 = arith.constant 0 : index
    %15 = vector.load %arg3[%c592, %c0_12] : memref<872x128xf32, #tpu.memory_space<vmem>>, vector<8x16xf32>
    %cst_13 = arith.constant dense<0.000000e+00> : vector<128x16xf32>
    %16 = tpu.matmul %4, %15, %cst_13 {dimension_numbers = #tpu.dot_dimension_numbers<[1], [0], [0], [1], [0, 0, 1, 1], [], []>} : vector<128x8xf32>, vector<8x16xf32>, vector<128x16xf32> -> vector<128x16xf32>
    %17 = arith.addf %14, %16 : vector<128x16xf32>
    %cst_14 = arith.constant 0.000000e+00 : f32
    %18 = vector.broadcast %cst_14 : f32 to vector<128x16xf32>
    %19 = arith.cmpf ogt, %17, %18 : vector<128x16xf32>
    %cst_15 = arith.constant 2.000000e-02 : f32
    %20 = vector.broadcast %cst_15 : f32 to vector<128x16xf32>
    %21 = arith.mulf %20, %17 : vector<128x16xf32>
    %22 = arith.select %19, %17, %21 : vector<128x16xi1>, vector<128x16xf32>
    %c600 = arith.constant 600 : index
    %c0_16 = arith.constant 0 : index
    %23 = vector.load %arg3[%c600, %c0_16] : memref<872x128xf32, #tpu.memory_space<vmem>>, vector<16x4xf32>
    %cst_17 = arith.constant dense<0.000000e+00> : vector<128x4xf32>
    %24 = tpu.matmul %22, %23, %cst_17 {dimension_numbers = #tpu.dot_dimension_numbers<[1], [0], [0], [1], [0, 0, 1, 1], [], []>} : vector<128x16xf32>, vector<16x4xf32>, vector<128x4xf32> -> vector<128x4xf32>
    %c616 = arith.constant 616 : index
    %c0_18 = arith.constant 0 : index
    %25 = vector.load %arg3[%c616, %c0_18] : memref<872x128xf32, #tpu.memory_space<vmem>>, vector<1x4xf32>
    %26 = vector.broadcast %25 : vector<1x4xf32> to vector<128x4xf32>
    %27 = arith.addf %24, %26 : vector<128x4xf32>
    %cst_19 = arith.constant 0.000000e+00 : f32
    %28 = vector.broadcast %cst_19 : f32 to vector<128x4xf32>
    %29 = arith.maximumf %27, %28 : vector<128x4xf32>
    %c624 = arith.constant 624 : index
    %c0_20 = arith.constant 0 : index
    %30 = vector.load %arg3[%c624, %c0_20] : memref<872x128xf32, #tpu.memory_space<vmem>>, vector<4x32xf32>
    %cst_21 = arith.constant dense<0.000000e+00> : vector<128x32xf32>
    %31 = tpu.matmul %29, %30, %cst_21 {dimension_numbers = #tpu.dot_dimension_numbers<[1], [0], [0], [1], [0, 0, 1, 1], [], []>} : vector<128x4xf32>, vector<4x32xf32>, vector<128x32xf32> -> vector<128x32xf32>
    %c632 = arith.constant 632 : index
    %c0_22 = arith.constant 0 : index
    %32 = vector.load %arg3[%c632, %c0_22] : memref<872x128xf32, #tpu.memory_space<vmem>>, vector<8x32xf32>
    %cst_23 = arith.constant dense<0.000000e+00> : vector<128x32xf32>
    %33 = tpu.matmul %4, %32, %cst_23 {dimension_numbers = #tpu.dot_dimension_numbers<[1], [0], [0], [1], [0, 0, 1, 1], [], []>} : vector<128x8xf32>, vector<8x32xf32>, vector<128x32xf32> -> vector<128x32xf32>
    %34 = arith.mulf %31, %33 : vector<128x32xf32>
    %c256 = arith.constant 256 : index
    %c0_24 = arith.constant 0 : index
    %35 = vector.load %arg3[%c256, %c0_24] : memref<872x128xf32, #tpu.memory_space<vmem>>, vector<64x128xf32>
    %cst_25 = arith.constant dense<0.000000e+00> : vector<64x32xf32>
    %36 = tpu.matmul %35, %34, %cst_25 {dimension_numbers = #tpu.dot_dimension_numbers<[1], [0], [0], [1], [0, 0, 1, 1], [], []>} : vector<64x128xf32>, vector<128x32xf32>, vector<64x32xf32> -> vector<64x32xf32>
    %c640 = arith.constant 640 : index
    %c0_26 = arith.constant 0 : index
    %37 = vector.load %arg3[%c640, %c0_26] : memref<872x128xf32, #tpu.memory_space<vmem>>, vector<32x8xf32>
    %cst_27 = arith.constant dense<0.000000e+00> : vector<64x8xf32>
    %38 = tpu.matmul %36, %37, %cst_27 {dimension_numbers = #tpu.dot_dimension_numbers<[1], [0], [0], [1], [0, 0, 1, 1], [], []>} : vector<64x32xf32>, vector<32x8xf32>, vector<64x8xf32> -> vector<64x8xf32>
    %c672 = arith.constant 672 : index
    %c0_28 = arith.constant 0 : index
    %39 = vector.load %arg3[%c672, %c0_28] : memref<872x128xf32, #tpu.memory_space<vmem>>, vector<1x8xf32>
    %40 = vector.broadcast %39 : vector<1x8xf32> to vector<64x8xf32>
    %41 = arith.addf %38, %40 : vector<64x8xf32>
    %cst_29 = arith.constant 0.000000e+00 : f32
    %42 = vector.broadcast %cst_29 : f32 to vector<64x8xf32>
    %43 = arith.maximumf %41, %42 : vector<64x8xf32>
    %c680 = arith.constant 680 : index
    %c0_30 = arith.constant 0 : index
    %44 = vector.load %arg3[%c680, %c0_30] : memref<872x128xf32, #tpu.memory_space<vmem>>, vector<8x64xf32>
    %cst_31 = arith.constant dense<0.000000e+00> : vector<64x64xf32>
    %45 = tpu.matmul %43, %44, %cst_31 {dimension_numbers = #tpu.dot_dimension_numbers<[1], [0], [0], [1], [0, 0, 1, 1], [], []>} : vector<64x8xf32>, vector<8x64xf32>, vector<64x64xf32> -> vector<64x64xf32>
    %c688 = arith.constant 688 : index
    %c0_32 = arith.constant 0 : index
    %46 = vector.load %arg3[%c688, %c0_32] : memref<872x128xf32, #tpu.memory_space<vmem>>, vector<64x64xf32>
    %47 = arith.mulf %45, %46 : vector<64x64xf32>
    %c816 = arith.constant 816 : index
    %c0_33 = arith.constant 0 : index
    %48 = vector.load %arg3[%c816, %c0_33] : memref<872x128xf32, #tpu.memory_space<vmem>>, vector<8x64xf32>
    %c752 = arith.constant 752 : index
    %c0_34 = arith.constant 0 : index
    %49 = vector.load %arg3[%c752, %c0_34] : memref<872x128xf32, #tpu.memory_space<vmem>>, vector<64x16xf32>
    %cst_35 = arith.constant dense<0.000000e+00> : vector<64x16xf32>
    %50 = tpu.matmul %47, %49, %cst_35 {dimension_numbers = #tpu.dot_dimension_numbers<[1], [0], [0], [1], [0, 0, 1, 1], [], []>} : vector<64x64xf32>, vector<64x16xf32>, vector<64x16xf32> -> vector<64x16xf32>
    %cst_36 = arith.constant dense<0.000000e+00> : vector<8x16xf32>
    %51 = tpu.matmul %48, %50, %cst_36 {dimension_numbers = #tpu.dot_dimension_numbers<[1], [0], [0], [1], [0, 0, 1, 1], [], []>} : vector<8x64xf32>, vector<64x16xf32>, vector<8x16xf32> -> vector<8x16xf32>
    %c832 = arith.constant 832 : index
    %c0_37 = arith.constant 0 : index
    %52 = vector.load %arg3[%c832, %c0_37] : memref<872x128xf32, #tpu.memory_space<vmem>>, vector<4x16xf32>
    %cst_38 = arith.constant dense<0.000000e+00> : vector<8x16xf32>
    %53 = tpu.matmul %1, %52, %cst_38 {dimension_numbers = #tpu.dot_dimension_numbers<[1], [0], [0], [1], [0, 0, 1, 1], [], []>} : vector<8x4xf32>, vector<4x16xf32>, vector<8x16xf32> -> vector<8x16xf32>
    %54 = arith.addf %51, %53 : vector<8x16xf32>
    %c840 = arith.constant 840 : index
    %c0_39 = arith.constant 0 : index
    %55 = vector.load %arg3[%c840, %c0_39] : memref<872x128xf32, #tpu.memory_space<vmem>>, vector<1x16xf32>
    %56 = vector.broadcast %55 : vector<1x16xf32> to vector<8x16xf32>
    %57 = arith.addf %54, %56 : vector<8x16xf32>
    %cst_40 = arith.constant 0.000000e+00 : f32
    %58 = vector.broadcast %cst_40 : f32 to vector<8x16xf32>
    %59 = arith.cmpf ogt, %57, %58 : vector<8x16xf32>
    %cst_41 = arith.constant 0.00999999977 : f32
    %60 = vector.broadcast %cst_41 : f32 to vector<8x16xf32>
    %61 = arith.mulf %60, %57 : vector<8x16xf32>
    %62 = arith.select %59, %57, %61 : vector<8x16xi1>, vector<8x16xf32>
    %c848 = arith.constant 848 : index
    %c0_42 = arith.constant 0 : index
    %63 = vector.load %arg3[%c848, %c0_42] : memref<872x128xf32, #tpu.memory_space<vmem>>, vector<16x8xf32>
    %cst_43 = arith.constant dense<0.000000e+00> : vector<8x8xf32>
    %64 = tpu.matmul %62, %63, %cst_43 {dimension_numbers = #tpu.dot_dimension_numbers<[1], [0], [0], [1], [0, 0, 1, 1], [], []>} : vector<8x16xf32>, vector<16x8xf32>, vector<8x8xf32> -> vector<8x8xf32>
    %c864 = arith.constant 864 : index
    %c0_44 = arith.constant 0 : index
    %65 = vector.load %arg3[%c864, %c0_44] : memref<872x128xf32, #tpu.memory_space<vmem>>, vector<1x8xf32>
    %66 = vector.broadcast %65 : vector<1x8xf32> to vector<8x8xf32>
    %67 = arith.addf %64, %66 : vector<8x8xf32>
    %cst_45 = arith.constant 0.000000e+00 : f32
    %68 = vector.broadcast %cst_45 : f32 to vector<8x8xf32>
    %69 = arith.maximumf %67, %68 : vector<8x8xf32>
    %c824 = arith.constant 824 : index
    %c0_46 = arith.constant 0 : index
    %70 = vector.load %arg3[%c824, %c0_46] : memref<872x128xf32, #tpu.memory_space<vmem>>, vector<8x64xf32>
    %cst_47 = arith.constant dense<0.000000e+00> : vector<8x64xf32>
    %71 = tpu.matmul %69, %70, %cst_47 {dimension_numbers = #tpu.dot_dimension_numbers<[1], [0], [0], [1], [0, 0, 1, 1], [], []>} : vector<8x8xf32>, vector<8x64xf32>, vector<8x64xf32> -> vector<8x64xf32>
    %c816_48 = arith.constant 816 : index
    %c0_49 = arith.constant 0 : index
    %72 = vector.load %arg3[%c816_48, %c0_49] : memref<872x128xf32, #tpu.memory_space<vmem>>, vector<8x64xf32>
    %73 = arith.mulf %71, %72 : vector<8x64xf32>
    %cst_50 = arith.constant dense<0.000000e+00> : vector<8x8xf32>
    %74 = tpu.matmul %73, %43, %cst_50 {dimension_numbers = #tpu.dot_dimension_numbers<[1], [0], [0], [1], [0, 0, 1, 1], [], []>} : vector<8x64xf32>, vector<64x8xf32>, vector<8x8xf32> -> vector<8x8xf32>
    %c0_51 = arith.constant 0 : index
    %c0_52 = arith.constant 0 : index
    %75 = vector.load %arg4[%c0_51, %c0_52] : memref<8x8xf32, #tpu.memory_space<vmem>>, vector<8x8xf32>
    tpu.vector_store %arg4[%c0_51, %c0_52], %74 {strides = array<i32>} : memref<8x8xf32, #tpu.memory_space<vmem>>, vector<8x8xf32>,
    return
  }
  func.func @transform_0(%arg0: i32) -> (i32, i32) {
    %c0_i32 = arith.constant 0 : i32
    %c0_i32_0 = arith.constant 0 : i32
    return %arg0, %c0_i32 : i32, i32
  }
  func.func @transform_1(%arg0: i32) -> (i32, i32) {
    %c0_i32 = arith.constant 0 : i32
    %c0_i32_0 = arith.constant 0 : i32
    return %arg0, %c0_i32 : i32, i32
  }
  func.func @transform_2(%arg0: i32) -> (i32, i32) {
    %c0_i32 = arith.constant 0 : i32
    %c0_i32_0 = arith.constant 0 : i32
    %c0_i32_1 = arith.constant 0 : i32
    return %c0_i32, %c0_i32_0 : i32, i32
  }
  func.func @transform_3(%arg0: i32) -> (i32, i32) {
    %c0_i32 = arith.constant 0 : i32
    %c0_i32_0 = arith.constant 0 : i32
    return %arg0, %c0_i32 : i32, i32
  }
}

</mosaic_0001>

<bundles_post_ra>
// kernel: wdsgcn2_forward.1
= control target key start
LH: loop header
LB: loop body
LE: loop exit
PB: predicated region body
PF: predicated region fallthrough
CT: control target
= control target key end

     0   :  { %8 = vsyncpa [#allocation3], 0  ;;  %s3684_s12 = smov [#allocation2]   ;;  %s4027_s0 = inlined_call_operand.vmem [shape: f32[96,8], index: 0, kind: input, shape index: {}]   ;;  %s4028_s1 = inlined_call_operand.vmem [shape: f32[8,4], index: 1, kind: input, shape index: {}]   ;;  %s4029_s2 = inlined_call_operand.hbm [shape: f32[872,128], index: 2, kind: input, shape index: {}]   ;;  %s4030_s3 = inlined_call_operand.vmem [shape: f32[8,8], index: 3, kind: output, shape index: {}]  }
   0x1   :  { %s18_s13 = sshll.u32 %s3684_s12, 4  ;;  %s3660_s16 = scalar_lea.hbm %s4029_s2, 13952  ;;  %s19_s13 = int_to_ptr.vmem [resolvable:$true] %s18_s13 }
   0x2   :  { %p3661_p0 = scmp.ne.s32.totalorder %s4029_s2, %s3660_s16  ;;  %p3664_p1 = scmp.lt.u32.totalorder %s3660_s16, %s4029_s2 }
   0x4   :  { %p3666_p2 = pnand %p3664_p1, %p3661_p0 }
   0x6   :  { %3669 = shalt.err (!%p3666_p2)
}
   0x7   :  { %s3670_s21 = scalar_lea.vmem %s19_s13, 13952  ;;  %p3675_p4 = scmp.lt.s32.totalorder %s19_s13, %s19_s13 }
   0x8   :  { %p3671_p3 = scmp.ne.s32.totalorder %s19_s13, %s3670_s21  ;;  %p3676_p5 = scmp.lt.s32.totalorder %s3670_s21, %s3670_s21 }
   0xa   :  { %p3677_p6 = por %p3676_p5, %p3675_p4 }
   0xc   :  { %p3678_p7 = pnand %p3677_p6, %p3671_p3 }
   0xe   :  { %3681 = shalt.err (!%p3678_p7)
}
   0xf   :  { %s3685_s22 = smov 128   ;;  %s3686_s23 = smov 8  }
  0x10   :  { %24 = dma.hbm_to_vmem [thread:$0]  %s4029_s2, 13952, %s19_s13, [#allocation3], %s3685_s22, %s3685_s22, %s3686_s23  }
  0x11   :  { %3682 = dma.done.wait [#allocation3], 13952  }
  0x12   :  { %3683 = vsyncadd [#allocation3], 4294953344  ;;  %v3687_v0 = vmov 0.0   ;;  %vm3688_vm0 = vmmov 0   ;;  %v28_v1 = vld [vmem:[%s4027_s0] sm:$0xff]  ;;  %v29_v2 = vld [vmem:[%s4027_s0 + $0x8] sm:$0xff] }
  0x13   :  { %3168 = vmatprep.subr.mxu1 %v3687_v0  ;;  %3170 = vmatprep.mubr.msk.f32.mxu1 %vm3688_vm0, %v3687_v0  ;;  %v30_v3 = vld [vmem:[%s4027_s0 + $0x10] sm:$0xff]  ;;  %v3492_v4 = vpack.c.bf16 %v29_v2, %v28_v1  ;;  %v31_v5 = vld [vmem:[%s4027_s0 + $0x18] sm:$0xff]  ;;  %v32_v7 = vld [vmem:[%s4027_s0 + $0x20] sm:$0xff]  ;;  %vm432_vm1 = vcmask 1043456   ;;  %vm428_vm2 = vcmask 31744   ;;  %vm73_vm3 = vcmask 785408  }
  0x14   :  { %v3496_v6 = vpack.c.bf16 %v31_v5, %v30_v3  ;;  %v33_v8 = vld [vmem:[%s4027_s0 + $0x28] sm:$0xff]  ;;  %v427_v9 = vld [vmem:[#allocation2 + $0x240] sm:$0xf]  ;;  %v34_v13 = vld [vmem:[%s4027_s0 + $0x30] sm:$0xff]  ;;  %vm506_vm4 = vcmask 64512   ;;  %vm1191_vm7 = vcmask 130048  }
  0x15   :  { %3493 = vmatprep.subr.bf16.mxu0 %v3492_v4  ;;  %v40_v10 = vld [vmem:[%s4028_s1] sm:$0xff]  ;;  %v3500_v12 = vpack.c.bf16 %v33_v8, %v32_v7  ;;  %3169 = vmatpush3.msk.msra.mxu1 %vm432_vm1, %v427_v9  ;;  %v35_v14 = vld [vmem:[%s4027_s0 + $0x38] sm:$0xff]  ;;  %v37_v17 = vld [vmem:[%s4027_s0 + $0x48] sm:$0xff] }
  0x16   :  { %3495 = vmatpush3.bf16.msra.mxu0 %v3492_v4  ;;  %v41_v11 = vld [vmem:[#allocation2] sm:$0xff]  ;;  %3171 = vmatmul.mubr.msk.f32.vlgmr.msra.gmra.mrb[0].mxu1 %vm428_vm2, %v40_v10  ;;  %v3504_v15 = vpack.c.bf16 %v35_v14, %v34_v13  ;;  %v38_v19 = vld [vmem:[%s4027_s0 + $0x50] sm:$0xff]  ;;  %v39_v20 = vld [vmem:[%s4027_s0 + $0x58] sm:$0xff] }
  0x17   :  { %3497 = vmatprep.subr.bf16.mxu0 %v3496_v6  ;;  %3120 = vmatprep.mubr.msk.f32.mxu0 %vm73_vm3, %v41_v11  ;;  %v36_v16 = vld [vmem:[%s4027_s0 + $0x40] sm:$0xff]  ;;  %v3512_v21 = vpack.c.bf16 %v39_v20, %v38_v19  ;;  %v42_v22 = vld [vmem:[#allocation2 + $0x8] sm:$0xff]  ;;  %v43_v23 = vld [vmem:[#allocation2 + $0x10] sm:$0xff] }
  0x18   :  { %v3508_v18 = vpack.c.bf16 %v37_v17, %v36_v16  ;;  %v44_v24 = vld [vmem:[#allocation2 + $0x18] sm:$0xff]  ;;  %v45_v25 = vld [vmem:[#allocation2 + $0x20] sm:$0xff]  ;;  %v46_v26 = vld [vmem:[#allocation2 + $0x28] sm:$0xff] }
  0x19   :  { %v47_v27 = vld [vmem:[#allocation2 + $0x30] sm:$0xff]  ;;  %v48_v28 = vld [vmem:[#allocation2 + $0x38] sm:$0xff]  ;;  %v49_v29 = vld [vmem:[#allocation2 + $0x40] sm:$0xff] }
  0x1a   :  { %3499 = vmatpush3.bf16.msra.mxu0 %v3496_v6  ;;  %v50_v30 = vld [vmem:[#allocation2 + $0x48] sm:$0xff]  ;;  %v51_v31 = vld [vmem:[#allocation2 + $0x50] sm:$0xff]  ;;  %v52_v32 = vld [vmem:[#allocation2 + $0x58] sm:$0xff] }
  0x1b   :  { %3501 = vmatprep.subr.bf16.mxu0 %v3500_v12  ;;  %v53_v33 = vld [vmem:[#allocation2 + $0x60] sm:$0xff]  ;;  %v54_v34 = vld [vmem:[#allocation2 + $0x68] sm:$0xff]  ;;  %v55_v35 = vld [vmem:[#allocation2 + $0x70] sm:$0xff] }
  0x1c   :  { %v56_v36 = vld [vmem:[#allocation2 + $0x78] sm:$0xff]  ;;  %v57_v37 = vld [vmem:[#allocation2 + $0x80] sm:$0xff]  ;;  %v58_v38 = vld [vmem:[#allocation2 + $0x88] sm:$0xff] }
  0x1d   :  { %v59_v39 = vld [vmem:[#allocation2 + $0x90] sm:$0xff]  ;;  %v60_v40 = vld [vmem:[#allocation2 + $0x98] sm:$0xff]  ;;  %v61_v41 = vld [vmem:[#allocation2 + $0xa0] sm:$0xff] }
  0x1e   :  { %3503 = vmatpush3.bf16.msra.mxu0 %v3500_v12  ;;  %v62_v42 = vld [vmem:[#allocation2 + $0xa8] sm:$0xff]  ;;  %v63_v43 = vld [vmem:[#allocation2 + $0xb0] sm:$0xff]  ;;  %v64_v44 = vld [vmem:[#allocation2 + $0xb8] sm:$0xff] }
  0x1f   :  { %3505 = vmatprep.subr.bf16.mxu0 %v3504_v15  ;;  %v65_v45 = vld [vmem:[#allocation2 + $0xc0] sm:$0xff]  ;;  %v66_v46 = vld [vmem:[#allocation2 + $0xc8] sm:$0xff]  ;;  %v67_v47 = vld [vmem:[#allocation2 + $0xd0] sm:$0xff] }
  0x20   :  { %v68_v48 = vld [vmem:[#allocation2 + $0xd8] sm:$0xff]  ;;  %v69_v49 = vld [vmem:[#allocation2 + $0xe0] sm:$0xff]  ;;  %v70_v50 = vld [vmem:[#allocation2 + $0xe8] sm:$0xff] }
  0x21   :  { %v71_v51 = vld [vmem:[#allocation2 + $0xf0] sm:$0xff]  ;;  %v72_v52 = vld [vmem:[#allocation2 + $0xf8] sm:$0xff]  ;;  %v411_v53 = vld [vmem:[#allocation2 + $0x1c0] sm:$0xff] }
  0x22   :  { %3507 = vmatpush3.bf16.msra.mxu0 %v3504_v15  ;;  %3175 = vmatprep.mubr.msk.f32.mxu1 %vm506_vm4, %v411_v53  ;;  %v1184_v54 = vld [vmem:[#allocation2 + $0x258] sm:$0xff]  ;;  %v1185_v55 = vld [vmem:[#allocation2 + $0x260] sm:$0xff]  ;;  %v412_v58 = vld [vmem:[#allocation2 + $0x1c8] sm:$0xff] }
  0x23   :  { %3509 = vmatprep.subr.bf16.mxu0 %v3508_v18  ;;  %v3799_v56 = vpack.c.bf16 %v1185_v55, %v1184_v54  ;;  %v716_v59 = vld [vmem:[#allocation2 + $0x248] sm:$0xff]  ;;  %v413_v61 = vld [vmem:[#allocation2 + $0x1d0] sm:$0xff]  ;;  %v414_v63 = vld [vmem:[#allocation2 + $0x1d8] sm:$0xff] }
  0x24   :  { %v926_v62 = vld [vmem:[#allocation2 + $0x250] sm:$0xff]  ;;  %v415_v1 = vld [vmem:[#allocation2 + $0x1e0] sm:$0xff]  ;;  %v416_v2 = vld [vmem:[#allocation2 + $0x1e8] sm:$0xff] }
  0x25   :  { %v417_v3 = vld [vmem:[#allocation2 + $0x1f0] sm:$0xff]  ;;  %v418_v4 = vld [vmem:[#allocation2 + $0x1f8] sm:$0xff]  ;;  %v419_v5 = vld [vmem:[#allocation2 + $0x200] sm:$0xff] }
  0x26   :  { %3511 = vmatpush3.bf16.msra.mxu0 %v3508_v18  ;;  %v420_v6 = vld [vmem:[#allocation2 + $0x208] sm:$0xff]  ;;  %v421_v7 = vld [vmem:[#allocation2 + $0x210] sm:$0xff]  ;;  %v422_v8 = vld [vmem:[#allocation2 + $0x218] sm:$0xff] }
  0x27   :  { %3513 = vmatprep.subr.bf16.mxu0 %v3512_v21  ;;  %v423_v10 = vld [vmem:[#allocation2 + $0x220] sm:$0xff]  ;;  %v424_v12 = vld [vmem:[#allocation2 + $0x228] sm:$0xff]  ;;  %v425_v14 = vld [vmem:[#allocation2 + $0x230] sm:$0xff] }
  0x28   :  { %v426_v16 = vld [vmem:[#allocation2 + $0x238] sm:$0xff]  ;;  %v397_v54 = vld [vmem:[#allocation2 + $0x150] sm:$0xff] }
  0x2a   :  { %3515 = vmatpush3.bf16.msra.mxu0 %v3512_v21 }
  0x2b   :  { %3517 = vmatprep.subr.bf16.mxu0 %v3799_v56 }
  0x2d   :  { %3121 = vmatmul.mubr.msk.f32.vlgmr.msra.gmra.mrb[0].mxu0 %vm73_vm3, %v42_v22 }
  0x2e   :  { %3123 = vmatprep.mubr.msk.f32.mxu0 %vm73_vm3, %v43_v23  ;;  %3519 = vmatpush3.bf16.msra.mxu0 %v3799_v56 }
  0x31   :  { %3124 = vmatmul.mubr.msk.f32.gmra.mrb[2].mxu0 %vm73_vm3, %v44_v24 }
  0x32   :  { %3126 = vmatprep.mubr.msk.f32.mxu0 %vm73_vm3, %v45_v25 }
  0x35   :  { %3127 = vmatmul.mubr.msk.f32.gmra.mrb[4].mxu0 %vm73_vm3, %v46_v26 }
  0x36   :  { %3129 = vmatprep.mubr.msk.f32.mxu0 %vm73_vm3, %v47_v27 }
  0x39   :  { %3130 = vmatmul.mubr.msk.f32.gmra.mrb[6].mxu0 %vm73_vm3, %v48_v28 }
  0x3a   :  { %3132 = vmatprep.mubr.msk.f32.mxu0 %vm73_vm3, %v49_v29 }
  0x3d   :  { %3133 = vmatmul.mubr.msk.f32.gmra.mrb[8].mxu0 %vm73_vm3, %v50_v30 }
  0x3e   :  { %3135 = vmatprep.mubr.msk.f32.mxu0 %vm73_vm3, %v51_v31 }
  0x41   :  { %3136 = vmatmul.mubr.msk.f32.gmra.mrb[10].mxu0 %vm73_vm3, %v52_v32 }
  0x42   :  { %3138 = vmatprep.mubr.msk.f32.mxu0 %vm73_vm3, %v53_v33 }
  0x45   :  { %3139 = vmatmul.mubr.msk.f32.gmra.mrb[12].mxu0 %vm73_vm3, %v54_v34 }
  0x46   :  { %3141 = vmatprep.mubr.msk.f32.mxu0 %vm73_vm3, %v55_v35 }
  0x49   :  { %3142 = vmatmul.mubr.msk.f32.gmra.mrb[14].mxu0 %vm73_vm3, %v56_v36 }
  0x4a   :  { %3144 = vmatprep.mubr.msk.f32.mxu0 %vm73_vm3, %v57_v37 }
  0x4d   :  { %3145 = vmatmul.mubr.msk.f32.gmra.mrb[16].mxu0 %vm73_vm3, %v58_v38 }
  0x4e   :  { %3147 = vmatprep.mubr.msk.f32.mxu0 %vm73_vm3, %v59_v39 }
  0x51   :  { %3148 = vmatmul.mubr.msk.f32.gmra.mrb[18].mxu0 %vm73_vm3, %v60_v40 }
  0x52   :  { %3150 = vmatprep.mubr.msk.f32.mxu0 %vm73_vm3, %v61_v41 }
  0x55   :  { %3151 = vmatmul.mubr.msk.f32.gmra.mrb[20].mxu0 %vm73_vm3, %v62_v42 }
  0x56   :  { %3153 = vmatprep.mubr.msk.f32.mxu0 %vm73_vm3, %v63_v43 }
  0x59   :  { %3154 = vmatmul.mubr.msk.f32.gmra.mrb[22].mxu0 %vm73_vm3, %v64_v44 }
  0x5a   :  { %3156 = vmatprep.mubr.msk.f32.mxu0 %vm73_vm3, %v65_v45  ;;  %v1598_v45 = vld [vmem:[#allocation2 + $0x278] sm:$0xff] }
  0x5b   :  { %3305 = vmatprep.subr.mxu0 %v1598_v45 }
  0x5d   :  { %3157 = vmatmul.mubr.msk.f32.gmra.mrb[24].mxu0 %vm73_vm3, %v66_v46  ;;  %v396_v46 = vld [vmem:[#allocation2 + $0x148] sm:$0xff] }
  0x5e   :  { %3159 = vmatprep.mubr.msk.f32.mxu0 %vm73_vm3, %v67_v47  ;;  %v395_v47 = vld [vmem:[#allocation2 + $0x140] sm:$0xff] }
  0x61   :  { %3160 = vmatmul.mubr.msk.f32.gmra.mrb[26].mxu0 %vm73_vm3, %v68_v48 }
  0x62   :  { %3162 = vmatprep.mubr.msk.f32.mxu0 %vm73_vm3, %v69_v49 }
  0x65   :  { %3163 = vmatmul.mubr.msk.f32.gmra.mrb[28].mxu0 %vm73_vm3, %v70_v50 }
  0x66   :  { %3165 = vmatprep.mubr.msk.f32.mxu0 %vm73_vm3, %v71_v51 }
  0x69   :  { %3166 = vmatmul.mubr.msk.f32.gmra.mrb[30].mxu0 %vm73_vm3, %v72_v52  ;;  %v398_v52 = vld [vmem:[#allocation2 + $0x158] sm:$0xff] }
  0xe9   :  { %v502_v57 = vpop.f32.mrb[0].mxu1 }
  0xea   :  { %v3172_v60 = vpop.f32.mrb[1].mxu1  ;;  %3173 = vmatprep.subr.mxu1 %v502_v57 }
  0xeb   :  { %3174 = vmatpush3.msra.mxu1 %v502_v57 }
  0xec   :  { %3176 = vmatmul.mubr.msk.f32.vlgmr.msra.gmra.mrb[2].mxu1 %vm506_vm4, %v412_v58  ;;  %3199 = vmatprep.subr.mxu1 %v716_v59 }
  0xed   :  { %3200 = vmatpush3.msra.mxu1 %v716_v59  ;;  %3178 = vmatprep.mubr.msk.f32.mxu1 %vm506_vm4, %v413_v61  ;;  %v400_v61 = vld [vmem:[#allocation2 + $0x168] sm:$0xff] }
  0xee   :  { %3225 = vmatprep.subr.mxu1 %v926_v62 }
  0xf0   :  { %3179 = vmatmul.mubr.msk.f32.gmra.mrb[4].mxu1 %vm506_vm4, %v414_v63 }
  0xf1   :  { %3181 = vmatprep.mubr.msk.f32.mxu1 %vm506_vm4, %v415_v1  ;;  %v399_v1 = vld [vmem:[#allocation2 + $0x160] sm:$0xff] }
  0xf4   :  { %3182 = vmatmul.mubr.msk.f32.gmra.mrb[6].mxu1 %vm506_vm4, %v416_v2 }
  0xf5   :  { %3184 = vmatprep.mubr.msk.f32.mxu1 %vm506_vm4, %v417_v3 }
  0xf8   :  { %3185 = vmatmul.mubr.msk.f32.gmra.mrb[8].mxu1 %vm506_vm4, %v418_v4 }
  0xf9   :  { %3187 = vmatprep.mubr.msk.f32.mxu1 %vm506_vm4, %v419_v5 }
  0xfc   :  { %3188 = vmatmul.mubr.msk.f32.gmra.mrb[10].mxu1 %vm506_vm4, %v420_v6 }
  0xfd   :  { %3190 = vmatprep.mubr.msk.f32.mxu1 %vm506_vm4, %v421_v7 }
 0x100   :  { %v3813_v9 = vpop.f32.mrb[0].mxu0  ;;  %3191 = vmatmul.mubr.msk.f32.gmra.mrb[12].mxu1 %vm506_vm4, %v422_v8  ;;  %v402_v8 = vld [vmem:[#allocation2 + $0x178] sm:$0xff] }
 0x101   :  { %v3815_v11 = vpop.f32.mrb[1].mxu0  ;;  %3193 = vmatprep.mubr.msk.f32.mxu1 %vm506_vm4, %v423_v10 }
 0x104   :  { %v3819_v13 = vpop.f32.mrb[2].mxu0  ;;  %3194 = vmatmul.mubr.msk.f32.gmra.mrb[14].mxu1 %vm506_vm4, %v424_v12 }
 0x105   :  { %v3821_v15 = vpop.f32.mrb[3].mxu0  ;;  %3196 = vmatprep.mubr.msk.f32.mxu1 %vm506_vm4, %v425_v14  ;;  %v401_v14 = vld [vmem:[#allocation2 + $0x170] sm:$0xff] }
 0x108   :  { %v3825_v17 = vpop.f32.mrb[4].mxu0  ;;  %3197 = vmatmul.mubr.msk.f32.gmra.mrb[16].mxu1 %vm506_vm4, %v426_v16 }
 0x109   :  { %v3827_v18 = vpop.f32.mrb[5].mxu0 }
 0x10c   :  { %v3830_v19 = vpop.f32.mrb[6].mxu0 }
 0x10d   :  { %v3832_v20 = vpop.f32.mrb[7].mxu0 }
 0x110   :  { %v3834_v21 = vpop.f32.mrb[8].mxu0 }
 0x111   :  { %v3836_v22 = vpop.f32.mrb[9].mxu0 }
 0x114   :  { %v3838_v23 = vpop.f32.mrb[10].mxu0 }
 0x115   :  { %v3840_v24 = vpop.f32.mrb[11].mxu0 }
 0x118   :  { %v3842_v25 = vpop.f32.mrb[12].mxu0 }
 0x119   :  { %v3844_v26 = vpop.f32.mrb[13].mxu0 }
 0x11c   :  { %v3846_v27 = vpop.f32.mrb[14].mxu0 }
 0x11d   :  { %v3848_v28 = vpop.f32.mrb[15].mxu0 }
 0x120   :  { %v3146_v29 = vpop.f32.mrb[16].mxu0 }
 0x121   :  { %v316_v30 = vpop.f32.mrb[17].mxu0 }
 0x122   :  { %3201 = vmatprep.mubr.msk.f32.mxu1 %vm506_vm4, %v316_v30 }
 0x123   :  { %3202 = vmatmul.mubr.msk.f32.vlgmr.msra.gmra.mrb[2].mxu1 %vm506_vm4, %v3146_v29 }
 0x124   :  { %v3149_v31 = vpop.f32.mrb[18].mxu0  ;;  %3226 = vmatpush3.msra.mxu1 %v926_v62 }
 0x125   :  { %v326_v32 = vpop.f32.mrb[19].mxu0  ;;  %3603 = vmatprep.subr.bf16.mxu1 %v3799_v56 }
 0x126   :  { %3204 = vmatprep.mubr.msk.f32.mxu1 %vm506_vm4, %v326_v32 }
 0x127   :  { %3205 = vmatmul.mubr.msk.f32.gmra.mrb[4].mxu1 %vm506_vm4, %v3149_v31 }
 0x128   :  { %v3152_v33 = vpop.f32.mrb[20].mxu0 }
 0x129   :  { %v336_v34 = vpop.f32.mrb[21].mxu0 }
 0x12a   :  { %3207 = vmatprep.mubr.msk.f32.mxu1 %vm506_vm4, %v336_v34  ;;  %v404_v34 = vld [vmem:[#allocation2 + $0x188] sm:$0xff] }
 0x12b   :  { %3208 = vmatmul.mubr.msk.f32.gmra.mrb[6].mxu1 %vm506_vm4, %v3152_v33 }
 0x12c   :  { %v3155_v35 = vpop.f32.mrb[22].mxu0 }
 0x12d   :  { %v346_v36 = vpop.f32.mrb[23].mxu0 }
 0x12e   :  { %3210 = vmatprep.mubr.msk.f32.mxu1 %vm506_vm4, %v346_v36 }
 0x12f   :  { %3211 = vmatmul.mubr.msk.f32.gmra.mrb[8].mxu1 %vm506_vm4, %v3155_v35 }
 0x130   :  { %v3158_v37 = vpop.f32.mrb[24].mxu0 }
 0x131   :  { %v356_v38 = vpop.f32.mrb[25].mxu0 }
 0x132   :  { %3213 = vmatprep.mubr.msk.f32.mxu1 %vm506_vm4, %v356_v38 }
 0x133   :  { %3214 = vmatmul.mubr.msk.f32.gmra.mrb[10].mxu1 %vm506_vm4, %v3158_v37  ;;  %v403_v37 = vld [vmem:[#allocation2 + $0x180] sm:$0xff] }
 0x134   :  { %v3161_v39 = vpop.f32.mrb[26].mxu0 }
 0x135   :  { %v366_v40 = vpop.f32.mrb[27].mxu0 }
 0x136   :  { %3216 = vmatprep.mubr.msk.f32.mxu1 %vm506_vm4, %v366_v40 }
 0x137   :  { %3217 = vmatmul.mubr.msk.f32.gmra.mrb[12].mxu1 %vm506_vm4, %v3161_v39 }
 0x138   :  { %v3164_v41 = vpop.f32.mrb[28].mxu0 }
 0x139   :  { %v376_v42 = vpop.f32.mrb[29].mxu0 }
 0x13a   :  { %3219 = vmatprep.mubr.msk.f32.mxu1 %vm506_vm4, %v376_v42 }
 0x13b   :  { %3220 = vmatmul.mubr.msk.f32.gmra.mrb[14].mxu1 %vm506_vm4, %v3164_v41 }
 0x13c   :  { %v3167_v43 = vpop.f32.mrb[30].mxu0 }
 0x13d   :  { %v386_v44 = vpop.f32.mrb[31].mxu0 }
 0x13e   :  { %3222 = vmatprep.mubr.msk.f32.mxu1 %vm506_vm4, %v386_v44  ;;  %v406_v44 = vld [vmem:[#allocation2 + $0x198] sm:$0xff] }
 0x13f   :  { %3223 = vmatmul.mubr.msk.f32.gmra.mrb[16].mxu1 %vm506_vm4, %v3167_v43 }
 0x140   :  { %3227 = vmatprep.mubr.msk.f32.mxu1 %vm506_vm4, %v3815_v11 }
 0x143   :  { %3228 = vmatmul.mubr.msk.f32.vlgmr.msra.gmra.mrb[2].mxu1 %vm506_vm4, %v3813_v9 }
 0x144   :  { %3230 = vmatprep.mubr.msk.f32.mxu1 %vm506_vm4, %v3821_v15  ;;  %3604 = vmatpush3.bf16.msra.mxu1 %v3799_v56 }
 0x147   :  { %3231 = vmatmul.mubr.msk.f32.gmra.mrb[4].mxu1 %vm506_vm4, %v3819_v13 }
 0x148   :  { %3233 = vmatprep.mubr.msk.f32.mxu1 %vm506_vm4, %v3827_v18 }
 0x14b   :  { %3234 = vmatmul.mubr.msk.f32.gmra.mrb[6].mxu1 %vm506_vm4, %v3825_v17 }
 0x14c   :  { %3236 = vmatprep.mubr.msk.f32.mxu1 %vm506_vm4, %v3832_v20 }
 0x14f   :  { %3237 = vmatmul.mubr.msk.f32.gmra.mrb[8].mxu1 %vm506_vm4, %v3830_v19 }
 0x150   :  { %3239 = vmatprep.mubr.msk.f32.mxu1 %vm506_vm4, %v3836_v22 }
 0x153   :  { %3240 = vmatmul.mubr.msk.f32.gmra.mrb[10].mxu1 %vm506_vm4, %v3834_v21 }
 0x154   :  { %3242 = vmatprep.mubr.msk.f32.mxu1 %vm506_vm4, %v3840_v24 }
 0x157   :  { %3243 = vmatmul.mubr.msk.f32.gmra.mrb[12].mxu1 %vm506_vm4, %v3838_v23 }
 0x158   :  { %3245 = vmatprep.mubr.msk.f32.mxu1 %vm506_vm4, %v3844_v26 }
 0x15b   :  { %3246 = vmatmul.mubr.msk.f32.gmra.mrb[14].mxu1 %vm506_vm4, %v3842_v25 }
 0x15c   :  { %3248 = vmatprep.mubr.msk.f32.mxu1 %vm506_vm4, %v3848_v28 }
 0x15f   :  { %3249 = vmatmul.mubr.msk.f32.gmra.mrb[16].mxu1 %vm506_vm4, %v3846_v27 }
 0x216   :  { %v3229_v48 = vpop.f32.mrb[2].mxu1 }
 0x217   :  { %v3605_v49 = vadd.f32 %v3229_v48, %v396_v46  ;;  %v1041_v50 = vpop.f32.mrb[3].mxu1 }
 0x218   :  { %v3606_v51 = vadd.f32 %v1041_v50, %v395_v47  ;;  %v405_v47 = vld [vmem:[#allocation2 + $0x190] sm:$0xff] }
 0x219   :  { %v1153_v53 = vmul.f32 0.02, %v3605_v49  ;;  %vm1137_vm5 = vcmp.gt.f32.partialorder %v3605_v49, 0.0 }
 0x21a   :  { %vm1136_vm6 = vcmp.gt.f32.partialorder %v3606_v51, 0.0  ;;  %v1152_v55 = vmul.f32 0.02, %v3606_v51  ;;  %v3232_v56 = vpop.f32.mrb[4].mxu1 }
 0x21b   :  { %v3607_v57 = vadd.f32 %v3232_v56, %v398_v52  ;;  %v1051_v58 = vpop.f32.mrb[5].mxu1  ;;  %v1169_v62 = vsel %vm1137_vm5, %v3605_v49, %v1153_v53 }
 0x21c   :  { %v3608_v59 = vadd.f32 %v1051_v58, %v397_v54  ;;  %v1168_v60 = vsel %vm1136_vm6, %v3606_v51, %v1152_v55  ;;  %v408_v54 = vld [vmem:[#allocation2 + $0x1a8] sm:$0xff] }
 0x21d   :  { %v1155_v63 = vmul.f32 0.02, %v3607_v57  ;;  %3255 = vmatprep.mubr.msk.f32.mxu0 %vm1191_vm7, %v1168_v60  ;;  %vm1139_vm8 = vcmp.gt.f32.partialorder %v3607_v57, 0.0 }
 0x21e   :  { %vm1138_vm9 = vcmp.gt.f32.partialorder %v3608_v59, 0.0  ;;  %v1154_v2 = vmul.f32 0.02, %v3608_v59  ;;  %v3235_v3 = vpop.f32.mrb[6].mxu1  ;;  %3256 = vmatmul.mubr.msk.f32.vlgmr.msra.gmra.mrb[32].mxu0 %vm1191_vm7, %v1169_v62 }
 0x21f   :  { %v3609_v4 = vadd.f32 %v3235_v3, %v400_v61  ;;  %v1061_v5 = vpop.f32.mrb[7].mxu1  ;;  %3306 = vmatpush3.msra.mxu0 %v1598_v45  ;;  %v1171_v12 = vsel %vm1139_vm8, %v3607_v57, %v1155_v63  ;;  %v407_v57 = vld [vmem:[#allocation2 + $0x1a0] sm:$0xff] }
 0x220   :  { %v3610_v6 = vadd.f32 %v1061_v5, %v399_v1  ;;  %v1170_v7 = vsel %vm1138_vm9, %v3608_v59, %v1154_v2  ;;  %v410_v1 = vld [vmem:[#allocation2 + $0x1b8] sm:$0xff] }
 0x221   :  { %v1157_v10 = vmul.f32 0.02, %v3609_v4  ;;  %3258 = vmatprep.mubr.msk.f32.mxu0 %vm1191_vm7, %v1170_v7  ;;  %vm1141_vm10 = vcmp.gt.f32.partialorder %v3609_v4, 0.0 }
 0x222   :  { %vm1140_vm11 = vcmp.gt.f32.partialorder %v3610_v6, 0.0  ;;  %v1156_v16 = vmul.f32 0.02, %v3610_v6  ;;  %v3238_v29 = vpop.f32.mrb[8].mxu1  ;;  %3259 = vmatmul.mubr.msk.f32.gmra.mrb[34].mxu0 %vm1191_vm7, %v1171_v12 }
 0x223   :  { %v3611_v30 = vadd.f32 %v3238_v29, %v402_v8  ;;  %v1071_v31 = vpop.f32.mrb[9].mxu1  ;;  %v1173_v36 = vsel %vm1141_vm10, %v3609_v4, %v1157_v10  ;;  %v409_v4 = vld [vmem:[#allocation2 + $0x1b0] sm:$0xff] }
 0x224   :  { %v3612_v32 = vadd.f32 %v1071_v31, %v401_v14  ;;  %v1172_v33 = vsel %vm1140_vm11, %v3610_v6, %v1156_v16  ;;  %vm1882_vm11 = vcmask 261120  }
 0x225   :  { %v1159_v35 = vmul.f32 0.02, %v3611_v30  ;;  %3261 = vmatprep.mubr.msk.f32.mxu0 %vm1191_vm7, %v1172_v33  ;;  %vm1143_vm12 = vcmp.gt.f32.partialorder %v3611_v30, 0.0 }
 0x226   :  { %vm1142_vm13 = vcmp.gt.f32.partialorder %v3612_v32, 0.0  ;;  %v1158_v38 = vmul.f32 0.02, %v3612_v32  ;;  %v3241_v39 = vpop.f32.mrb[10].mxu1  ;;  %3262 = vmatmul.mubr.msk.f32.gmra.mrb[36].mxu0 %vm1191_vm7, %v1173_v36 }
 0x227   :  { %v3613_v40 = vadd.f32 %v3241_v39, %v404_v34  ;;  %v1081_v41 = vpop.f32.mrb[11].mxu1  ;;  %v1175_v46 = vsel %vm1143_vm12, %v3611_v30, %v1159_v35  ;;  %vm2175_vm12 = vcmask 523264  }
 0x228   :  { %v3614_v42 = vadd.f32 %v1081_v41, %v403_v37  ;;  %v1174_v43 = vsel %vm1142_vm13, %v3612_v32, %v1158_v38 }
 0x229   :  { %v1161_v45 = vmul.f32 0.02, %v3613_v40  ;;  %3264 = vmatprep.mubr.msk.f32.mxu0 %vm1191_vm7, %v1174_v43  ;;  %vm1145_vm14 = vcmp.gt.f32.partialorder %v3613_v40, 0.0 }
 0x22a   :  { %vm1144_vm15 = vcmp.gt.f32.partialorder %v3614_v42, 0.0  ;;  %v1160_v48 = vmul.f32 0.02, %v3614_v42  ;;  %v3244_v49 = vpop.f32.mrb[12].mxu1  ;;  %3265 = vmatmul.mubr.msk.f32.gmra.mrb[38].mxu0 %vm1191_vm7, %v1175_v46 }
 0x22b   :  { %v3615_v50 = vadd.f32 %v3244_v49, %v406_v44  ;;  %v1091_v51 = vpop.f32.mrb[13].mxu1  ;;  %v1177_v56 = vsel %vm1145_vm14, %v3613_v40, %v1161_v45 }
 0x22c   :  { %v3616_v52 = vadd.f32 %v1091_v51, %v405_v47  ;;  %v1176_v53 = vsel %vm1144_vm15, %v3614_v42, %v1160_v48 }
 0x22d   :  { %v1163_v55 = vmul.f32 0.02, %v3615_v50  ;;  %3267 = vmatprep.mubr.msk.f32.mxu0 %vm1191_vm7, %v1176_v53  ;;  %vm1147_vm3 = vcmp.gt.f32.partialorder %v3615_v50, 0.0 }
 0x22e   :  { %vm1146_vm5 = vcmp.gt.f32.partialorder %v3616_v52, 0.0  ;;  %v1162_v58 = vmul.f32 0.02, %v3616_v52  ;;  %v3247_v59 = vpop.f32.mrb[14].mxu1  ;;  %3268 = vmatmul.mubr.msk.f32.gmra.mrb[40].mxu0 %vm1191_vm7, %v1177_v56 }
 0x22f   :  { %v3617_v60 = vadd.f32 %v3247_v59, %v408_v54  ;;  %v1101_v61 = vpop.f32.mrb[15].mxu1  ;;  %v1179_v3 = vsel %vm1147_vm3, %v3615_v50, %v1163_v55 }
 0x230   :  { %v3618_v62 = vadd.f32 %v1101_v61, %v407_v57  ;;  %v1178_v63 = vsel %vm1146_vm5, %v3616_v52, %v1162_v58 }
 0x231   :  { %v1165_v2 = vmul.f32 0.02, %v3617_v60  ;;  %3270 = vmatprep.mubr.msk.f32.mxu0 %vm1191_vm7, %v1178_v63  ;;  %vm1149_vm6 = vcmp.gt.f32.partialorder %v3617_v60, 0.0 }
 0x232   :  { %vm1148_vm8 = vcmp.gt.f32.partialorder %v3618_v62, 0.0  ;;  %v1164_v5 = vmul.f32 0.02, %v3618_v62  ;;  %v3250_v6 = vpop.f32.mrb[16].mxu1  ;;  %3271 = vmatmul.mubr.msk.f32.gmra.mrb[42].mxu0 %vm1191_vm7, %v1179_v3 }
 0x233   :  { %v3619_v7 = vadd.f32 %v3250_v6, %v410_v1  ;;  %v1111_v8 = vpop.f32.mrb[17].mxu1  ;;  %v1181_v16 = vsel %vm1149_vm6, %v3617_v60, %v1165_v2 }
 0x234   :  { %v3620_v10 = vadd.f32 %v1111_v8, %v409_v4  ;;  %v1180_v12 = vsel %vm1148_vm8, %v3618_v62, %v1164_v5 }
 0x235   :  { %v1167_v14 = vmul.f32 0.02, %v3619_v7  ;;  %3273 = vmatprep.mubr.msk.f32.mxu0 %vm1191_vm7, %v1180_v12  ;;  %vm1151_vm9 = vcmp.gt.f32.partialorder %v3619_v7, 0.0 }
 0x236   :  { %vm1150_vm10 = vcmp.gt.f32.partialorder %v3620_v10, 0.0  ;;  %v1166_v29 = vmul.f32 0.02, %v3620_v10  ;;  %3274 = vmatmul.mubr.msk.f32.gmra.mrb[44].mxu0 %vm1191_vm7, %v1181_v16 }
 0x237   :  { %3307 = vmatprep.mubr.msk.f32.mxu0 %vm506_vm4, %v3815_v11  ;;  %v1183_v31 = vsel %vm1151_vm9, %v3619_v7, %v1167_v14  ;;  %v2778_v11 = vld [vmem:[#allocation2 + $0x268] ss:$0 sm:$0xff] }
 0x238   :  { %v1182_v30 = vsel %vm1150_vm10, %v3620_v10, %v1166_v29 }
 0x239   :  { %3276 = vmatprep.mubr.msk.f32.mxu1 %vm1191_vm7, %v1182_v30 }
 0x23a   :  { %3277 = vmatmul.mubr.msk.f32.vlgmr.msra.gmra.mrb[18].mxu1 %vm1191_vm7, %v1183_v31  ;;  %3308 = vmatmul.mubr.msk.f32.vlgmr.msra.gmra.mrb[46].mxu0 %vm506_vm4, %v3813_v9  ;;  %v1401_v9 = vld [vmem:[#allocation2 + $0x270] sm:$0xf] }
 0x23b   :  { %3310 = vmatprep.mubr.msk.f32.mxu0 %vm506_vm4, %v3821_v15  ;;  %3279 = vmatprep.subr.msk.mxu1 %vm432_vm1, %v1401_v9 }
 0x23c   :  { %3280 = vmatpush3.msk.msra.mxu1 %vm432_vm1, %v1401_v9 }
 0x23e   :  { %3311 = vmatmul.mubr.msk.f32.gmra.mrb[48].mxu0 %vm506_vm4, %v3819_v13 }
 0x23f   :  { %3313 = vmatprep.mubr.msk.f32.mxu0 %vm506_vm4, %v3827_v18 }
 0x242   :  { %3314 = vmatmul.mubr.msk.f32.gmra.mrb[50].mxu0 %vm506_vm4, %v3825_v17 }
 0x243   :  { %3316 = vmatprep.mubr.msk.f32.mxu0 %vm506_vm4, %v3832_v20 }
 0x246   :  { %3317 = vmatmul.mubr.msk.f32.gmra.mrb[52].mxu0 %vm506_vm4, %v3830_v19 }
 0x247   :  { %3319 = vmatprep.mubr.msk.f32.mxu0 %vm506_vm4, %v3836_v22 }
 0x24a   :  { %3320 = vmatmul.mubr.msk.f32.gmra.mrb[54].mxu0 %vm506_vm4, %v3834_v21 }
 0x24b   :  { %3322 = vmatprep.mubr.msk.f32.mxu0 %vm506_vm4, %v3840_v24 }
 0x24e   :  { %3323 = vmatmul.mubr.msk.f32.gmra.mrb[56].mxu0 %vm506_vm4, %v3838_v23 }
 0x24f   :  { %3325 = vmatprep.mubr.msk.f32.mxu0 %vm506_vm4, %v3844_v26 }
 0x252   :  { %3326 = vmatmul.mubr.msk.f32.gmra.mrb[58].mxu0 %vm506_vm4, %v3842_v25 }
 0x253   :  { %3328 = vmatprep.mubr.msk.f32.mxu0 %vm506_vm4, %v3848_v28 }
 0x256   :  { %3329 = vmatmul.mubr.msk.f32.gmra.mrb[60].mxu0 %vm506_vm4, %v3846_v27 }
 0x2f1   :  { %v3257_v13 = vpop.f32.mrb[32].mxu0 }
 0x2f2   :  { %v1312_v15 = vadd.f32 %v3257_v13, %v2778_v11  ;;  %v1306_v17 = vpop.f32.mrb[33].mxu0 }
 0x2f3   :  { %v1307_v18 = vadd.f32 %v2778_v11, %v1306_v17 }
 0x2f4   :  { %v1386_v21 = vmax.f32 %v1312_v15, 0.0  ;;  %v1760_v15 = vld [vmem:[#allocation2 + $0x100] sm:$0xff] }
 0x2f5   :  { %v1385_v19 = vmax.f32 %v1307_v18, 0.0  ;;  %v3260_v20 = vpop.f32.mrb[34].mxu0 }
 0x2f6   :  { %v1322_v22 = vadd.f32 %v3260_v20, %v2778_v11  ;;  %v1316_v23 = vpop.f32.mrb[35].mxu0 }
 0x2f7   :  { %v1317_v24 = vadd.f32 %v2778_v11, %v1316_v23  ;;  %3281 = vmatprep.mubr.msk.f32.mxu1 %vm428_vm2, %v1385_v19 }
 0x2f8   :  { %3282 = vmatmul.mubr.msk.f32.vlgmr.msra.gmra.mrb[20].mxu1 %vm428_vm2, %v1386_v21  ;;  %v1388_v27 = vmax.f32 %v1322_v22, 0.0 }
 0x2f9   :  { %v1387_v25 = vmax.f32 %v1317_v24, 0.0  ;;  %v3263_v26 = vpop.f32.mrb[36].mxu0 }
 0x2fa   :  { %v1332_v28 = vadd.f32 %v3263_v26, %v2778_v11  ;;  %v1326_v32 = vpop.f32.mrb[37].mxu0 }
 0x2fb   :  { %v1327_v33 = vadd.f32 %v2778_v11, %v1326_v32  ;;  %3284 = vmatprep.mubr.msk.f32.mxu1 %vm428_vm2, %v1387_v25 }
 0x2fc   :  { %3285 = vmatmul.mubr.msk.f32.gmra.mrb[22].mxu1 %vm428_vm2, %v1388_v27  ;;  %v1390_v36 = vmax.f32 %v1332_v28, 0.0 }
 0x2fd   :  { %v1389_v34 = vmax.f32 %v1327_v33, 0.0  ;;  %v3266_v35 = vpop.f32.mrb[38].mxu0 }
 0x2fe   :  { %v1342_v37 = vadd.f32 %v3266_v35, %v2778_v11  ;;  %v1336_v38 = vpop.f32.mrb[39].mxu0 }
 0x2ff   :  { %v1337_v39 = vadd.f32 %v2778_v11, %v1336_v38  ;;  %3287 = vmatprep.mubr.msk.f32.mxu1 %vm428_vm2, %v1389_v34 }
 0x300   :  { %3288 = vmatmul.mubr.msk.f32.gmra.mrb[24].mxu1 %vm428_vm2, %v1390_v36  ;;  %v1392_v42 = vmax.f32 %v1342_v37, 0.0 }
 0x301   :  { %v1391_v40 = vmax.f32 %v1337_v39, 0.0  ;;  %v3269_v41 = vpop.f32.mrb[40].mxu0 }
 0x302   :  { %v1352_v43 = vadd.f32 %v3269_v41, %v2778_v11  ;;  %v1346_v44 = vpop.f32.mrb[41].mxu0 }
 0x303   :  { %v1347_v45 = vadd.f32 %v2778_v11, %v1346_v44  ;;  %3290 = vmatprep.mubr.msk.f32.mxu1 %vm428_vm2, %v1391_v40 }
 0x304   :  { %3291 = vmatmul.mubr.msk.f32.gmra.mrb[26].mxu1 %vm428_vm2, %v1392_v42  ;;  %v1394_v48 = vmax.f32 %v1352_v43, 0.0 }
 0x305   :  { %v1393_v46 = vmax.f32 %v1347_v45, 0.0  ;;  %v3272_v47 = vpop.f32.mrb[42].mxu0 }
 0x306   :  { %v1362_v49 = vadd.f32 %v3272_v47, %v2778_v11  ;;  %v1356_v50 = vpop.f32.mrb[43].mxu0 }
 0x307   :  { %v1357_v51 = vadd.f32 %v2778_v11, %v1356_v50  ;;  %3293 = vmatprep.mubr.msk.f32.mxu1 %vm428_vm2, %v1393_v46 }
 0x308   :  { %3294 = vmatmul.mubr.msk.f32.gmra.mrb[28].mxu1 %vm428_vm2, %v1394_v48  ;;  %v1396_v54 = vmax.f32 %v1362_v49, 0.0 }
 0x309   :  { %v1395_v52 = vmax.f32 %v1357_v51, 0.0  ;;  %v3275_v53 = vpop.f32.mrb[44].mxu0 }
 0x30a   :  { %v1372_v55 = vadd.f32 %v3275_v53, %v2778_v11  ;;  %v1366_v56 = vpop.f32.mrb[45].mxu0 }
 0x30b   :  { %v1367_v57 = vadd.f32 %v2778_v11, %v1366_v56  ;;  %3296 = vmatprep.mubr.msk.f32.mxu1 %vm428_vm2, %v1395_v52 }
 0x30c   :  { %3297 = vmatmul.mubr.msk.f32.gmra.mrb[30].mxu1 %vm428_vm2, %v1396_v54  ;;  %v1398_v61 = vmax.f32 %v1372_v55, 0.0 }
 0x30d   :  { %v1397_v58 = vmax.f32 %v1367_v57, 0.0  ;;  %v3278_v59 = vpop.f32.mrb[18].mxu1  ;;  %v3309_v60 = vpop.f32.mrb[46].mxu0 }
 0x30e   :  { %v1382_v62 = vadd.f32 %v3278_v59, %v2778_v11  ;;  %v1376_v63 = vpop.f32.mrb[19].mxu1  ;;  %v1665_v1 = vpop.f32.mrb[47].mxu0  ;;  %v1874_v59 = vld [vmem:[#allocation2 + $0x288] sm:$0xff] }
 0x30f   :  { %v1377_v2 = vadd.f32 %v2778_v11, %v1376_v63  ;;  %3299 = vmatprep.mubr.msk.f32.mxu1 %vm428_vm2, %v1397_v58  ;;  %v1873_v58 = vld [vmem:[#allocation2 + $0x280] sm:$0xff]  ;;  %v1875_v63 = vld [vmem:[#allocation2 + $0x290] sm:$0xff] }
 0x310   :  { %3300 = vmatmul.mubr.msk.f32.gmra.mrb[32].mxu1 %vm428_vm2, %v1398_v61  ;;  %v1400_v5 = vmax.f32 %v1382_v62, 0.0  ;;  %v3552_v62 = vpack.c.bf16 %v1874_v59, %v1873_v58  ;;  %v2174_v58 = vld [vmem:[#allocation2 + $0x328] sm:$0xff] }
 0x311   :  { %v1399_v3 = vmax.f32 %v1377_v2, 0.0  ;;  %v3312_v4 = vpop.f32.mrb[48].mxu0  ;;  %v1761_v2 = vld [vmem:[#allocation2 + $0x108] sm:$0xff] }
 0x312   :  { %v1675_v6 = vpop.f32.mrb[49].mxu0 }
 0x313   :  { %3302 = vmatprep.mubr.msk.f32.mxu1 %vm428_vm2, %v1399_v3  ;;  %v1762_v3 = vld [vmem:[#allocation2 + $0x110] sm:$0xff] }
 0x314   :  { %3303 = vmatmul.mubr.msk.f32.gmra.mrb[34].mxu1 %vm428_vm2, %v1400_v5  ;;  %v1763_v5 = vld [vmem:[#allocation2 + $0x118] sm:$0xff] }
 0x315   :  { %v3315_v7 = vpop.f32.mrb[50].mxu0  ;;  %3363 = vmatprep.mubr.f32.mxu1 %v1760_v15  ;;  %v2167_v15 = vld [vmem:[#allocation2 + $0x2f0] sm:$0xff] }
 0x316   :  { %v1685_v8 = vpop.f32.mrb[51].mxu0 }
 0x319   :  { %v3318_v10 = vpop.f32.mrb[52].mxu0 }
 0x31a   :  { %v1695_v12 = vpop.f32.mrb[53].mxu0 }
 0x31d   :  { %v3321_v14 = vpop.f32.mrb[54].mxu0 }
 0x31e   :  { %v1705_v16 = vpop.f32.mrb[55].mxu0 }
 0x321   :  { %v3324_v29 = vpop.f32.mrb[56].mxu0 }
 0x322   :  { %v1715_v30 = vpop.f32.mrb[57].mxu0 }
 0x325   :  { %v3327_v31 = vpop.f32.mrb[58].mxu0 }
 0x326   :  { %v1725_v9 = vpop.f32.mrb[59].mxu0 }
 0x329   :  { %v3330_v11 = vpop.f32.mrb[60].mxu0 }
 0x32a   :  { %v1735_v13 = vpop.f32.mrb[61].mxu0 }
 0x3cb   :  { %v3283_v17 = vpop.f32.mrb[20].mxu1 }
 0x3cc   :  { %v1745_v18 = vmul.f32 %v3309_v60, %v3283_v17  ;;  %v1519_v19 = vpop.f32.mrb[21].mxu1  ;;  %v2168_v17 = vld [vmem:[#allocation2 + $0x2f8] sm:$0xff] }
 0x3cd   :  { %v1744_v20 = vmul.f32 %v1665_v1, %v1519_v19  ;;  %v1876_v1 = vld [vmem:[#allocation2 + $0x298] sm:$0xff]  ;;  %v3560_v19 = vpack.c.bf16 %v2168_v17, %v2167_v15 }
 0x3cf   :  { %v3520_v21 = vpack.c.bf16 %v1745_v18, %v1744_v20  ;;  %v3286_v22 = vpop.f32.mrb[22].mxu1  ;;  %v2169_v18 = vld [vmem:[#allocation2 + $0x300] sm:$0xff]  ;;  %v2170_v20 = vld [vmem:[#allocation2 + $0x308] sm:$0xff] }
 0x3d0   :  { %v1747_v23 = vmul.f32 %v3312_v4, %v3286_v22  ;;  %v1529_v24 = vpop.f32.mrb[23].mxu1  ;;  %v3556_v4 = vpack.c.bf16 %v1876_v1, %v1875_v63  ;;  %v2171_v22 = vld [vmem:[#allocation2 + $0x310] sm:$0xff] }
 0x3d1   :  { %v1746_v25 = vmul.f32 %v1675_v6, %v1529_v24  ;;  %3521 = vmatprep.subr.bf16.mxu1 %v3520_v21  ;;  %v1764_v6 = vld [vmem:[#allocation2 + $0x120] sm:$0xff] }
 0x3d2   :  { %3523 = vmatpush3.bf16.msra.mxu1 %v3520_v21  ;;  %v3564_v21 = vpack.c.bf16 %v2170_v20, %v2169_v18  ;;  %v3689_v18 = vmov 0.0|0.0   ;;  %v3659_v20 = vld [vmem:[%s4028_s1] sm:$0xff] }
 0x3d3   :  { %v3524_v26 = vpack.c.bf16 %v1747_v23, %v1746_v25  ;;  %v3289_v27 = vpop.f32.mrb[24].mxu1  ;;  %v2172_v23 = vld [vmem:[#allocation2 + $0x318] sm:$0xff]  ;;  %v2828_v25 = vld [vmem:[#allocation2 + $0x2a0] ss:$0 sm:$0xff] }
 0x3d4   :  { %v1749_v28 = vmul.f32 %v3315_v7, %v3289_v27  ;;  %v1539_v32 = vpop.f32.mrb[25].mxu1  ;;  %v1765_v7 = vld [vmem:[#allocation2 + $0x128] sm:$0xff]  ;;  %v3568_v24 = vpack.c.bf16 %v2172_v23, %v2171_v22 }
 0x3d5   :  { %v1748_v33 = vmul.f32 %v1685_v8, %v1539_v32  ;;  %3525 = vmatprep.subr.bf16.mxu1 %v3524_v26  ;;  %v1766_v8 = vld [vmem:[#allocation2 + $0x130] sm:$0xff] }
 0x3d6   :  { %3527 = vmatpush3.bf16.msra.mxu1 %v3524_v26 }
 0x3d7   :  { %v3528_v34 = vpack.c.bf16 %v1749_v28, %v1748_v33  ;;  %v3292_v35 = vpop.f32.mrb[26].mxu1 }
 0x3d8   :  { %v1751_v36 = vmul.f32 %v3318_v10, %v3292_v35  ;;  %v1549_v37 = vpop.f32.mrb[27].mxu1  ;;  %v1767_v10 = vld [vmem:[#allocation2 + $0x138] sm:$0xff] }
 0x3d9   :  { %v1750_v38 = vmul.f32 %v1695_v12, %v1549_v37  ;;  %3529 = vmatprep.subr.bf16.mxu1 %v3528_v34  ;;  %v2020_v12 = vld [vmem:[#allocation2 + $0x2a8] sm:$0xff] }
 0x3da   :  { %3531 = vmatpush3.bf16.msra.mxu1 %v3528_v34  ;;  %3395 = vmatprep.subr.mxu0 %v2020_v12 }
 0x3db   :  { %v3532_v39 = vpack.c.bf16 %v1751_v36, %v1750_v38  ;;  %v3295_v40 = vpop.f32.mrb[28].mxu1  ;;  %3396 = vmatpush3.msra.mxu0 %v2020_v12 }
 0x3dc   :  { %v1753_v41 = vmul.f32 %v3321_v14, %v3295_v40  ;;  %v1559_v42 = vpop.f32.mrb[29].mxu1  ;;  %3437 = vmatprep.subr.mxu0 %v3687_v0 }
 0x3dd   :  { %v1752_v43 = vmul.f32 %v1705_v16, %v1559_v42  ;;  %3533 = vmatprep.subr.bf16.mxu1 %v3532_v39 }
 0x3de   :  { %3535 = vmatpush3.bf16.msra.mxu1 %v3532_v39 }
 0x3df   :  { %v3536_v44 = vpack.c.bf16 %v1753_v41, %v1752_v43  ;;  %v3298_v45 = vpop.f32.mrb[30].mxu1 }
 0x3e0   :  { %v1755_v46 = vmul.f32 %v3324_v29, %v3298_v45  ;;  %v1569_v47 = vpop.f32.mrb[31].mxu1 }
 0x3e1   :  { %v1754_v48 = vmul.f32 %v1715_v30, %v1569_v47  ;;  %3537 = vmatprep.subr.bf16.mxu1 %v3536_v44 }
 0x3e2   :  { %3539 = vmatpush3.bf16.msra.mxu1 %v3536_v44 }
 0x3e3   :  { %v3540_v49 = vpack.c.bf16 %v1755_v46, %v1754_v48  ;;  %v3301_v50 = vpop.f32.mrb[32].mxu1 }
 0x3e4   :  { %v1757_v51 = vmul.f32 %v3327_v31, %v3301_v50  ;;  %v1579_v52 = vpop.f32.mrb[33].mxu1 }
 0x3e5   :  { %v1756_v53 = vmul.f32 %v1725_v9, %v1579_v52  ;;  %3541 = vmatprep.subr.bf16.mxu1 %v3540_v49 }
 0x3e6   :  { %3543 = vmatpush3.bf16.msra.mxu1 %v3540_v49 }
 0x3e7   :  { %v3544_v54 = vpack.c.bf16 %v1757_v51, %v1756_v53  ;;  %v3304_v55 = vpop.f32.mrb[34].mxu1 }
 0x3e8   :  { %v1759_v56 = vmul.f32 %v3330_v11, %v3304_v55  ;;  %v1589_v57 = vpop.f32.mrb[35].mxu1 }
 0x3e9   :  { %v1758_v60 = vmul.f32 %v1735_v13, %v1589_v57  ;;  %3545 = vmatprep.subr.bf16.mxu1 %v3544_v54  ;;  %v2173_v57 = vld [vmem:[#allocation2 + $0x320] sm:$0xff] }
 0x3ea   :  { %3547 = vmatpush3.bf16.msra.mxu1 %v3544_v54  ;;  %v3572_v59 = vpack.c.bf16 %v2174_v58, %v2173_v57 }
 0x3eb   :  { %v3548_v61 = vpack.c.bf16 %v1759_v56, %v1758_v60  ;;  %v2150_v60 = vld [vmem:[#allocation2 + $0x2b0] sm:$0xff] }
 0x3ed   :  { %3549 = vmatprep.subr.bf16.mxu1 %v3548_v61 }
 0x3ee   :  { %3551 = vmatpush3.bf16.msra.mxu1 %v3548_v61 }
 0x3ef   :  { %3553 = vmatprep.subr.bf16.mxu1 %v3552_v62 }
 0x3f1   :  { %3364 = vmatmul.mubr.f32.vlgmr.msra.gmra.mrb[36].mxu1 %v1761_v2 }
 0x3f2   :  { %3366 = vmatprep.mubr.f32.mxu1 %v1762_v3  ;;  %3555 = vmatpush3.bf16.msra.mxu1 %v3552_v62  ;;  %v2151_v62 = vld [vmem:[#allocation2 + $0x2b8] sm:$0xff]  ;;  %v2152_v3 = vld [vmem:[#allocation2 + $0x2c0] sm:$0xff] }
 0x3f3   :  { %3557 = vmatprep.subr.bf16.mxu1 %v3556_v4 }
 0x3f5   :  { %3367 = vmatmul.mubr.f32.gmra.mrb[38].mxu1 %v1763_v5  ;;  %v2153_v5 = vld [vmem:[#allocation2 + $0x2c8] sm:$0xff] }
 0x3f6   :  { %3369 = vmatprep.mubr.f32.mxu1 %v1764_v6  ;;  %3559 = vmatpush3.bf16.msra.mxu1 %v3556_v4 }
 0x3f7   :  { %3561 = vmatprep.subr.bf16.mxu1 %v3560_v19 }
 0x3f9   :  { %3370 = vmatmul.mubr.f32.gmra.mrb[40].mxu1 %v1765_v7 }
 0x3fa   :  { %3372 = vmatprep.mubr.f32.mxu1 %v1766_v8 }
 0x3fd   :  { %3373 = vmatmul.mubr.f32.gmra.mrb[42].mxu1 %v1767_v10  ;;  %v2154_v10 = vld [vmem:[#allocation2 + $0x2d0] sm:$0xff] }
 0x4c4   :  { %v3365_v14 = vpop.f32.mrb[36].mxu1 }
 0x4c5   :  { %v1834_v16 = vpop.f32.mrb[37].mxu1 }
 0x4c6   :  { %3383 = vmatprep.mubr.msk.f32.mxu1 %vm1882_vm11, %v1834_v16 }
 0x4c7   :  { %3384 = vmatmul.mubr.msk.f32.vlgmr.msra.gmra.mrb[44].mxu1 %vm1882_vm11, %v3365_v14  ;;  %v2155_v14 = vld [vmem:[#allocation2 + $0x2d8] sm:$0xff] }
 0x4c8   :  { %v3368_v29 = vpop.f32.mrb[38].mxu1  ;;  %3563 = vmatpush3.bf16.msra.mxu1 %v3560_v19  ;;  %v2305_v19 = vld [vmem:[#allocation2 + $0x340] sm:$0xf] }
 0x4c9   :  { %v1844_v30 = vpop.f32.mrb[39].mxu1  ;;  %3565 = vmatprep.subr.bf16.mxu1 %v3564_v21 }
 0x4ca   :  { %3386 = vmatprep.mubr.msk.f32.mxu1 %vm1882_vm11, %v1844_v30 }
 0x4cb   :  { %3387 = vmatmul.mubr.msk.f32.gmra.mrb[46].mxu1 %vm1882_vm11, %v3368_v29 }
 0x4cc   :  { %v3371_v31 = vpop.f32.mrb[40].mxu1  ;;  %3567 = vmatpush3.bf16.msra.mxu1 %v3564_v21 }
 0x4cd   :  { %v1854_v9 = vpop.f32.mrb[41].mxu1  ;;  %3569 = vmatprep.subr.bf16.mxu1 %v3568_v24 }
 0x4ce   :  { %3389 = vmatprep.mubr.msk.f32.mxu1 %vm1882_vm11, %v1854_v9 }
 0x4cf   :  { %3390 = vmatmul.mubr.msk.f32.gmra.mrb[48].mxu1 %vm1882_vm11, %v3371_v31  ;;  %v2156_v31 = vld [vmem:[#allocation2 + $0x2e0] sm:$0xff] }
 0x4d0   :  { %v3374_v11 = vpop.f32.mrb[42].mxu1  ;;  %3571 = vmatpush3.bf16.msra.mxu1 %v3568_v24 }
 0x4d1   :  { %v1864_v13 = vpop.f32.mrb[43].mxu1  ;;  %3573 = vmatprep.subr.bf16.mxu1 %v3572_v59 }
 0x4d2   :  { %3392 = vmatprep.mubr.msk.f32.mxu1 %vm1882_vm11, %v1864_v13 }
 0x4d3   :  { %3393 = vmatmul.mubr.msk.f32.gmra.mrb[50].mxu1 %vm1882_vm11, %v3374_v11  ;;  %v2157_v11 = vld [vmem:[#allocation2 + $0x2e8] sm:$0xff] }
 0x4d4   :  { %3575 = vmatpush3.bf16.msra.mxu1 %v3572_v59 }
 0x4d5   :  { %3576 = vmatprep.subr.bf16.mxu1 %v3689_v18 }
 0x59a   :  { %v3385_v26 = vpop.f32.mrb[44].mxu1 }
 0x59b   :  { %v1979_v27 = vadd.f32 %v3385_v26, %v2828_v25  ;;  %v1973_v28 = vpop.f32.mrb[45].mxu1 }
 0x59c   :  { %v1974_v32 = vadd.f32 %v2828_v25, %v1973_v28 }
 0x59d   :  { %v2013_v33 = vmax.f32 %v1979_v27, 0.0 }
 0x59e   :  { %v2012_v34 = vmax.f32 %v1974_v32, 0.0  ;;  %v3388_v35 = vpop.f32.mrb[46].mxu1 }
 0x59f   :  { %v1989_v36 = vadd.f32 %v3388_v35, %v2828_v25  ;;  %v1983_v37 = vpop.f32.mrb[47].mxu1 }
 0x5a0   :  { %v3975_v38 = vpack.c.bf16 %v2013_v33, %v2012_v34  ;;  %v1984_v39 = vadd.f32 %v2828_v25, %v1983_v37  ;;  %3397 = vmatprep.mubr.msk.f32.mxu0 %vm506_vm4, %v2012_v34 }
 0x5a1   :  { %v2015_v40 = vmax.f32 %v1989_v36, 0.0  ;;  %3398 = vmatmul.mubr.msk.f32.vlgmr.msra.gmra.mrb[62].mxu0 %vm506_vm4, %v2013_v33  ;;  %v2166_v36 = vld [vmem:[#allocation2 + $0x330] sm:$0xff] }
 0x5a2   :  { %v2014_v41 = vmax.f32 %v1984_v39, 0.0  ;;  %v3391_v42 = vpop.f32.mrb[48].mxu1  ;;  %3438 = vmatpush3.msk.msra.mxu0 %vm432_vm1, %v2305_v19 }
 0x5a3   :  { %v1999_v43 = vadd.f32 %v3391_v42, %v2828_v25  ;;  %v1993_v44 = vpop.f32.mrb[49].mxu1  ;;  %3588 = vmatprep.subr.bf16.mxu0 %v3689_v18 }
 0x5a4   :  { %v3979_v45 = vpack.c.bf16 %v2015_v40, %v2014_v41  ;;  %v1994_v46 = vadd.f32 %v2828_v25, %v1993_v44  ;;  %3400 = vmatprep.mubr.msk.f32.mxu0 %vm506_vm4, %v2014_v41  ;;  %v2462_v41 = vld [vmem:[#allocation2 + $0x358] sm:$0xff]  ;;  %v2856_v44 = vld [vmem:[#allocation2 + $0x348] ss:$0 sm:$0xff] }
 0x5a5   :  { %v2017_v47 = vmax.f32 %v1999_v43, 0.0  ;;  %3401 = vmatmul.mubr.msk.f32.gmra.mrb[64].mxu0 %vm506_vm4, %v2015_v40  ;;  %v2461_v40 = vld [vmem:[#allocation2 + $0x350] sm:$0xff] }
 0x5a6   :  { %v2016_v48 = vmax.f32 %v1994_v46, 0.0  ;;  %v3394_v49 = vpop.f32.mrb[50].mxu1  ;;  %v3589_v42 = vpack.c.bf16 %v2462_v41, %v2461_v40 }
 0x5a7   :  { %v2009_v50 = vadd.f32 %v3394_v49, %v2828_v25  ;;  %v2003_v51 = vpop.f32.mrb[51].mxu1 }
 0x5a8   :  { %v3983_v52 = vpack.c.bf16 %v2017_v47, %v2016_v48  ;;  %v2004_v53 = vadd.f32 %v2828_v25, %v2003_v51  ;;  %3403 = vmatprep.mubr.msk.f32.mxu0 %vm506_vm4, %v2016_v48  ;;  %v2542_v51 = vld [vmem:[#allocation2 + $0x338] sm:$0xff] }
 0x5a9   :  { %v2019_v54 = vmax.f32 %v2009_v50, 0.0  ;;  %3404 = vmatmul.mubr.msk.f32.gmra.mrb[66].mxu0 %vm506_vm4, %v2017_v47 }
 0x5aa   :  { %v2018_v55 = vmax.f32 %v2004_v53, 0.0  ;;  %v2857_v53 = vld [vmem:[#allocation2 + $0x360] ss:$0 sm:$0xff] }
 0x5ac   :  { %v3987_v56 = vpack.c.bf16 %v2019_v54, %v2018_v55  ;;  %3406 = vmatprep.mubr.msk.f32.mxu0 %vm506_vm4, %v2018_v55 }
 0x5ad   :  { %3407 = vmatmul.mubr.msk.f32.gmra.mrb[68].mxu0 %vm506_vm4, %v2019_v54 }
 0x5ae   :  { %3439 = vmatprep.mubr.msk.f32.mxu0 %vm3688_vm0, %v3687_v0 }
 0x5b1   :  { %3440 = vmatmul.mubr.msk.f32.vlgmr.msra.gmra.mrb[70].mxu0 %vm428_vm2, %v3659_v20 }
 0x5b2   :  { %3465 = vmatprep.mubr.msk.f32.mxu0 %vm3688_vm0, %v3687_v0  ;;  %3590 = vmatpush3.bf16.msra.mxu0 %v3589_v42 }
 0x5b3   :  { %3468 = vmatprep.subr.mxu0 %v3687_v0 }
 0x674   :  { %v3399_v61 = vpop.f32.mrb[62].mxu0 }
 0x675   :  { %v2111_v63 = vpop.f32.mrb[63].mxu0  ;;  %v2159_v2 = vmul.f32 %v3399_v61, %v2151_v62 }
 0x676   :  { %v2158_v1 = vmul.f32 %v2150_v60, %v2111_v63 }
 0x678   :  { %v3402_v4 = vpop.f32.mrb[64].mxu0  ;;  %3425 = vmatprep.mubr.msk.f32.mxu1 %vm2175_vm12, %v2158_v1 }
 0x679   :  { %v2121_v6 = vpop.f32.mrb[65].mxu0  ;;  %3426 = vmatmul.mubr.msk.f32.vlgmr.msra.gmra.mrb[52].mxu1 %vm2175_vm12, %v2159_v2  ;;  %v2161_v8 = vmul.f32 %v3402_v4, %v2153_v5 }
 0x67a   :  { %v2160_v7 = vmul.f32 %v2152_v3, %v2121_v6 }
 0x67c   :  { %v3405_v12 = vpop.f32.mrb[66].mxu0  ;;  %3428 = vmatprep.mubr.msk.f32.mxu1 %vm2175_vm12, %v2160_v7 }
 0x67d   :  { %v2131_v16 = vpop.f32.mrb[67].mxu0  ;;  %3429 = vmatmul.mubr.msk.f32.gmra.mrb[54].mxu1 %vm2175_vm12, %v2161_v8  ;;  %v2163_v30 = vmul.f32 %v3405_v12, %v2155_v14 }
 0x67e   :  { %v2162_v29 = vmul.f32 %v2154_v10, %v2131_v16 }
 0x680   :  { %v3408_v9 = vpop.f32.mrb[68].mxu0  ;;  %3431 = vmatprep.mubr.msk.f32.mxu1 %vm2175_vm12, %v2162_v29 }
 0x681   :  { %v2141_v13 = vpop.f32.mrb[69].mxu0  ;;  %3432 = vmatmul.mubr.msk.f32.gmra.mrb[56].mxu1 %vm2175_vm12, %v2163_v30  ;;  %v2165_v17 = vmul.f32 %v3408_v9, %v2157_v11 }
 0x682   :  { %v2164_v15 = vmul.f32 %v2156_v31, %v2141_v13 }
 0x684   :  { %3434 = vmatprep.mubr.msk.f32.mxu1 %vm2175_vm12, %v2164_v15  ;;  %v2375_v37 = vpop.f32.mrb[70].mxu0 }
 0x685   :  { %3435 = vmatmul.mubr.msk.f32.gmra.mrb[58].mxu1 %vm2175_vm12, %v2165_v17  ;;  %v3441_v39 = vpop.f32.mrb[71].mxu0 }
 0x686   :  { %3458 = vmatprep.mubr.msk.f32.mxu1 %vm3688_vm0, %v3687_v0 }
 0x74c   :  { %v3427_v21 = vpop.f32.mrb[52].mxu1 }
 0x74d   :  { %v2266_v22 = vpop.f32.mrb[53].mxu1 }
 0x74e   :  { %v3577_v23 = vpack.c.bf16 %v3427_v21, %v2266_v22 }
 0x750   :  { %v3430_v24 = vpop.f32.mrb[54].mxu1  ;;  %3578 = vmatpush3.bf16.msra.mxu1 %v3577_v23 }
 0x751   :  { %v2276_v25 = vpop.f32.mrb[55].mxu1  ;;  %3579 = vmatprep.subr.bf16.mxu1 %v3689_v18 }
 0x752   :  { %v3580_v26 = vpack.c.bf16 %v3430_v24, %v2276_v25 }
 0x754   :  { %v3433_v27 = vpop.f32.mrb[56].mxu1  ;;  %3581 = vmatpush3.bf16.msra.mxu1 %v3580_v26 }
 0x755   :  { %v2286_v28 = vpop.f32.mrb[57].mxu1  ;;  %3582 = vmatprep.subr.bf16.mxu1 %v3689_v18 }
 0x756   :  { %v3583_v32 = vpack.c.bf16 %v3433_v27, %v2286_v28 }
 0x758   :  { %v3436_v33 = vpop.f32.mrb[58].mxu1  ;;  %3584 = vmatpush3.bf16.msra.mxu1 %v3583_v32 }
 0x759   :  { %v2296_v34 = vpop.f32.mrb[59].mxu1  ;;  %3585 = vmatprep.subr.bf16.mxu1 %v3689_v18 }
 0x75a   :  { %v3586_v35 = vpack.c.bf16 %v3436_v33, %v2296_v34 }
 0x75c   :  { %3587 = vmatpush3.bf16.msra.mxu1 %v3586_v35 }
 0x75f   :  { %3459 = vmatmul.mubr.msk.f32.vlgmr.msra.gmra.mrb[60].mxu1 %vm2175_vm12, %v2166_v36 }
 0x832   :  { %v2448_v43 = vpop.f32.mrb[60].mxu1 }
 0x833   :  { %v2449_v46 = vadd.f32 %v2448_v43, %v2375_v37  ;;  %v3460_v47 = vpop.f32.mrb[61].mxu1 }
 0x835   :  { %v2457_v48 = vadd.f32 %v2856_v44, %v2449_v46 }
 0x837   :  { %vm2458_vm1 = vcmp.gt.f32.partialorder %v2457_v48, 0.0  ;;  %v2459_v49 = vmul.f32 0.01, %v2457_v48 }
 0x839   :  { %v2460_v50 = vsel %vm2458_vm1, %v2457_v48, %v2459_v49 }
 0x83a   :  { %3466 = vmatmul.mubr.msk.f32.vlgmr.msra.gmra.mrb[72].mxu0 %vm1191_vm7, %v2460_v50 }
 0x83b   :  { %3470 = vmatprep.mubr.msk.f32.mxu0 %vm3688_vm0, %v3687_v0  ;;  %3469 = vmatpush3.msra.mxu0 %v2542_v51 }
 0x83c   :  { %3591 = vmatprep.subr.bf16.mxu0 %v3689_v18 }
 0x90d   :  { %v2537_v54 = vpop.f32.mrb[72].mxu0 }
 0x90e   :  { %v2538_v55 = vadd.f32 %v2857_v53, %v2537_v54  ;;  %v3467_v57 = vpop.f32.mrb[73].mxu0 }
 0x910   :  { %v2541_v58 = vmax.f32 %v2538_v55, 0.0 }
 0x912   :  { %3471 = vmatmul.mubr.msk.f32.vlgmr.msra.gmra.mrb[74].mxu0 %vm506_vm4, %v2541_v58 }
 0x913   :  { %3593 = vmatpush3.bf16.msra.mxu0 %v3975_v38  ;;  %3489 = vmatprep.mubr.msk.f32.mxu0 %vm3688_vm0, %v3687_v0 }
 0x914   :  { %3594 = vmatprep.subr.bf16.mxu0 %v3689_v18 }
 0x917   :  { %3596 = vmatpush3.bf16.msra.mxu0 %v3979_v45 }
 0x918   :  { %3597 = vmatprep.subr.bf16.mxu0 %v3689_v18 }
 0x91b   :  { %3599 = vmatpush3.bf16.msra.mxu0 %v3983_v52 }
 0x91c   :  { %3600 = vmatprep.subr.bf16.mxu0 %v3689_v18 }
 0x91f   :  { %3602 = vmatpush3.bf16.msra.mxu0 %v3987_v56 }
 0x9e5   :  { %v2612_v59 = vpop.f32.mrb[74].mxu0 }
 0x9e6   :  { %v2616_v60 = vmul.f32 %v2612_v59, %v2166_v36  ;;  %v3472_v61 = vpop.f32.mrb[75].mxu0 }
 0x9e8   :  { %3490 = vmatmul.mubr.msk.f32.vlgmr.msra.gmra.mrb[76].mxu0 %vm2175_vm12, %v2616_v60 }
 0xabb   :  { %v2686_v62 = vpop.f32.mrb[76].mxu0 }
 0xabc   :  { %2690 = vst.msk [vmem:[%s4030_s3] sm:$0xff] %vm506_vm4, %v2686_v62  ;;  %v3491_v0 = vpop.f32.mrb[77].mxu0 }
 0xabd   :  { %2695 = vsyncpa [#allocation3], 1 }

</bundles_post_ra>
